<compile_context>
chip_gen: v7x
topology: tpu7x:2x2x1
jax: 0.10.0
libtpu: 0.0.40
codegen_flags: <defaults>
</compile_context>

<pallas_src>
import functools
import math

import jax
import jax.numpy as jnp
from jax import lax
from jax.experimental import pallas as pl
from jax.experimental.pallas import tpu as pltpu

# ----------------------------- config (small LlamaConfig) -----------------------------
DIM = 128
N_HEADS = 4
N_KV_HEADS = 2
HEAD_DIM = DIM // N_HEADS            # 32
HIDDEN_DIM = 256
MAX_SEQ_LEN = 16
MAX_BATCH = 2
NORM_EPS = 1e-5
N_REP = N_HEADS // N_KV_HEADS        # 2
ROPE_THETA = 10000.0

Q_DIM = N_HEADS * HEAD_DIM           # 128
KV_DIM = N_KV_HEADS * HEAD_DIM       # 64


# ----------------------------------- Pallas kernel ------------------------------------
def _transformer_block_kernel(
    x_ref, ln1_ref, ln2_ref, wqkv_ref, wo_ref, w13_ref, w2_ref,
    cos_ref, sine_ref, sino_ref, ckv_in_ref,
    out_ref, ckv_out_ref,
    *, batch, seq_len, start_pos):
  hd = HEAD_DIM
  kv_len = start_pos + seq_len
  scale = 1.0 / math.sqrt(hd)

  def rmsnorm(v, w):
    var = jnp.mean(v * v, axis=-1, keepdims=True)
    return v * lax.rsqrt(var + NORM_EPS) * w

  def rope(v, cos, sin_e, sin_o):
    # Interleaved complex-pair rotation on the full width. Parity is pre-folded into
    # the sin tables (sin_e nonzero only on even lanes, sin_o only on odd lanes), so
    # the wrap-around lanes of the rolls are always multiplied by zero.
    w = v.shape[-1]
    nxt = pltpu.roll(v, w - 1, axis=1)          # v[:, (i+1) % w]
    prv = pltpu.roll(v, 1, axis=1)              # v[:, (i-1) % w]
    return v * cos + nxt * sin_e + prv * sin_o

  x = x_ref[...]                                     # (B*S, D) f32

  # ---- input RMSNorm + fused QKV projection (single 256-lane MXU pass, bf16 ops) ----
  xn = rmsnorm(x, ln1_ref[...])
  qkv = jnp.dot(xn.astype(jnp.bfloat16), wqkv_ref[...],
                preferred_element_type=jnp.float32)  # (B*S, Q_DIM + 2*KV_DIM)
  xq = qkv[:, :Q_DIM]
  xk = qkv[:, Q_DIM:Q_DIM + KV_DIM]
  xv = qkv[:, Q_DIM + KV_DIM:]

  # ---- RoPE on full-width Q and K (tables are batch-tiled in the wrapper prep) ----
  cos = cos_ref[...]
  sin_e = sine_ref[...]
  sin_o = sino_ref[...]
  q_rot = rope(xq, cos, sin_e, sin_o)                          # (B*S, Q_DIM)
  k_rot = rope(xk, cos[:, :KV_DIM], sin_e[:, :KV_DIM], sin_o[:, :KV_DIM])

  # ---- KV cache writeback: one 128-lane-dense block covering exactly the new rows ----
  kv_new = jnp.concatenate([k_rot, xv], axis=-1)               # (B*S, 2*KV_DIM)
  for b in range(batch):
    ckv_out_ref[b] = kv_new[b * seq_len:(b + 1) * seq_len, :]

  # ---- causal mask generated in-kernel (rows are rep-major stacked query heads) ----
  row = lax.broadcasted_iota(jnp.int32, (N_REP * seq_len, kv_len), 0) % seq_len
  col = lax.broadcasted_iota(jnp.int32, (N_REP * seq_len, kv_len), 1)
  mask = jnp.where(col > row + start_pos, -1e9, 0.0)           # finite (NaN-safe)

  # ---- GQA attention (per batch, per kv head; N_REP query heads stacked on sublanes) ----
  attn_rows = []
  for b in range(batch):
    q_b = q_rot[b * seq_len:(b + 1) * seq_len, :]              # (S, Q_DIM)
    k_b = k_rot[b * seq_len:(b + 1) * seq_len, :]              # (S, KV_DIM)
    v_b = xv[b * seq_len:(b + 1) * seq_len, :]
    if start_pos > 0:
      ckv_prev = ckv_in_ref[b]                                 # (kv_len, 2*KV_DIM) live prefix
      keys = jnp.concatenate([ckv_prev[:start_pos, :KV_DIM], k_b], axis=0)
      vals = jnp.concatenate([ckv_prev[:start_pos, KV_DIM:], v_b], axis=0)
    else:
      keys, vals = k_b, v_b                                    # (kv_len, KV_DIM)

    head_out = [None] * N_HEADS
    for kvh in range(N_KV_HEADS):
      qg = jnp.concatenate(
          [q_b[:, (kvh * N_REP + r) * hd:(kvh * N_REP + r + 1) * hd]
           for r in range(N_REP)], axis=0)                     # (N_REP*S, hd)
      kg = keys[:, kvh * hd:(kvh + 1) * hd]                    # (kv_len, hd)
      vg = vals[:, kvh * hd:(kvh + 1) * hd]
      s = lax.dot_general(qg, kg, (((1,), (1,)), ((), ())),
                          preferred_element_type=jnp.float32) * scale
      s = s + mask
      m = jnp.max(s, axis=-1, keepdims=True)
      p = jnp.exp(s - m)
      denom = jnp.sum(p, axis=-1, keepdims=True)
      o = jnp.dot(p, vg, preferred_element_type=jnp.float32)   # unnormalized
      o = o * pl.reciprocal(denom, approx=True)                # deferred softmax norm (EUP)
      for r in range(N_REP):
        head_out[kvh * N_REP + r] = o[r * seq_len:(r + 1) * seq_len, :]
    attn_rows.append(jnp.concatenate(head_out, axis=1))        # (S, Q_DIM) lane concat

  attn = jnp.concatenate(attn_rows, axis=0)                    # (B*S, Q_DIM), stays in vregs

  # ---- output projection + residual ----
  h = x + jnp.dot(attn.astype(jnp.bfloat16), wo_ref[...],
                  preferred_element_type=jnp.float32)

  # ---- post-attention RMSNorm + fused SwiGLU FFN (gate/up in one 512-lane matmul) ----
  hn = rmsnorm(h, ln2_ref[...])
  gu = jnp.dot(hn.astype(jnp.bfloat16), w13_ref[...],
               preferred_element_type=jnp.float32)             # (B*S, 2*HIDDEN_DIM)
  gate = gu[:, :HIDDEN_DIM]
  up = gu[:, HIDDEN_DIM:]
  ff_in = gate * jax.nn.sigmoid(gate) * up
  ff = jnp.dot(ff_in.astype(jnp.bfloat16), w2_ref[...],
               preferred_element_type=jnp.float32)
  out_ref[...] = h + ff


# -------------------------- one-time constant prep (init, not per call) -----------------
def prepare_block_constants(params, start_pos, seq_len, batch):
  """Fuse/cast weights and build batch-tiled RoPE tables ONCE at model init."""
  wqkv = jnp.concatenate([params["wq"], params["wk"], params["wv"]],
                         axis=1).astype(jnp.bfloat16)            # (D, 256)
  w13 = jnp.concatenate([params["w1"], params["w3"]], axis=1).astype(jnp.bfloat16)
  wo = params["wo"].astype(jnp.bfloat16)
  w2 = params["w2"].astype(jnp.bfloat16)

  # RoPE tables for positions [start_pos, start_pos+seq_len): pair-duplicated cos and
  # parity-prefolded sin (even lanes carry -sin * v[i+1], odd lanes +sin * v[i-1]).
  inv_freq = 1.0 / (ROPE_THETA **
                    (jnp.arange(0, HEAD_DIM, 2, dtype=jnp.float32) / HEAD_DIM))
  t = jnp.arange(start_pos, start_pos + seq_len, dtype=jnp.float32)
  freqs = jnp.outer(t, inv_freq)
  cos_h, sin_h = jnp.cos(freqs), jnp.sin(freqs)
  cos_pair = jnp.repeat(cos_h, 2, axis=1)                        # (S, hd)
  sin_signed = jnp.stack([-sin_h, sin_h], axis=-1).reshape(seq_len, HEAD_DIM)
  lane = jnp.arange(HEAD_DIM) % 2
  sin_e = jnp.where(lane == 0, sin_signed, 0.0)
  sin_o = jnp.where(lane == 1, sin_signed, 0.0)

  def tile_q(tbl):  # (S, hd) -> (B*S, Q_DIM), batch-major rows, head-tiled lanes
    return jnp.tile(tbl, (batch, N_HEADS))

  return {
      "ln1": params["ln1"], "ln2": params["ln2"],
      "wqkv": wqkv, "wo": wo, "w13": w13, "w2": w2,
      "cos": tile_q(cos_pair), "sin_e": tile_q(sin_e), "sin_o": tile_q(sin_o),
  }


# ------------------------------------- wrapper -----------------------------------------
@functools.partial(jax.jit, static_argnums=(3,))
def transformer_block(x, consts, cache_kv, start_pos):
  """x: (B, S, D) f32; cache_kv: (B, MAX_SEQ_LEN, 2*KV_DIM) f32 (K in lanes 0..63, V 64..127)."""
  B, S, D = x.shape
  assert start_pos % S == 0, "cache writeback block requires start_pos % seq_len == 0"
  kv_len = start_pos + S
  x2d = x.reshape(B * S, D)                 # fold batch into sublanes (free reshape)

  kernel = functools.partial(_transformer_block_kernel,
                             batch=B, seq_len=S, start_pos=start_pos)

  def full(shape):
    n = len(shape)
    return pl.BlockSpec(shape, lambda i, _n=n: (0,) * _n)

  row_blk = start_pos // S
  ckv_in_spec = pl.BlockSpec((B, kv_len, 2 * KV_DIM), lambda i: (0, 0, 0))      # live prefix only
  ckv_out_spec = pl.BlockSpec((B, S, 2 * KV_DIM), lambda i: (0, row_blk, 0))    # new rows only

  out2d, ckv_new = pl.pallas_call(
      kernel,
      out_shape=(
          jax.ShapeDtypeStruct((B * S, D), jnp.float32),
          jax.ShapeDtypeStruct((B, MAX_SEQ_LEN, 2 * KV_DIM), jnp.float32),
      ),
      grid_spec=pltpu.PrefetchScalarGridSpec(
          num_scalar_prefetch=0,
          grid=(1,),                                      # single step, batch folded in rows
          in_specs=[
              full((B * S, D)),                           # 0: x (batch-folded)
              full((1, D)), full((1, D)),                 # 1,2: ln1, ln2
              full((D, Q_DIM + 2 * KV_DIM)),              # 3: fused wqkv (bf16)
              full((Q_DIM, D)),                           # 4: wo (bf16)
              full((D, 2 * HIDDEN_DIM)),                  # 5: fused w1|w3 (bf16)
              full((HIDDEN_DIM, D)),                      # 6: w2 (bf16)
              full((B * S, Q_DIM)),                       # 7: cos (pair-dup, tiled)
              full((B * S, Q_DIM)),                       # 8: sin_even (parity-folded)
              full((B * S, Q_DIM)),                       # 9: sin_odd (parity-folded)
              ckv_in_spec,                                # 10: merged KV cache (aliased -> out 1)
          ],
          out_specs=[
              full((B * S, D)),
              ckv_out_spec,
          ],
      ),
      input_output_aliases={10: 1},
      compiler_params=pltpu.CompilerParams(dimension_semantics=("arbitrary",)),
  )(x2d, consts["ln1"], consts["ln2"], consts["wqkv"], consts["wo"],
    consts["w13"], consts["w2"], consts["cos"], consts["sin_e"], consts["sin_o"],
    cache_kv)

  return out2d.reshape(B, S, D), ckv_new


# --------------------------- pure-JAX reference (PyTorch semantics) ---------------------
def _rope_ref(x, cos_h, sin_h):
  # x: (B, S, H, hd); interleaved complex-pair rotation (Meta apply_rotary_emb).
  xe, xo = x[..., 0::2], x[..., 1::2]
  c = cos_h[None, :, None, :]
  s = sin_h[None, :, None, :]
  oe = xe * c - xo * s
  oo = xe * s + xo * c
  return jnp.stack([oe, oo], axis=-1).reshape(x.shape)


def ref_forward(x, p, cache_k, cache_v, start_pos, cos_h, sin_h, mask):
  B, S, D = x.shape

  def rms(v, w):
    return v * lax.rsqrt(jnp.mean(v * v, axis=-1, keepdims=True) + NORM_EPS) * w

  xn = rms(x, p["ln1"])
  xq = (xn @ p["wq"]).reshape(B, S, N_HEADS, HEAD_DIM)
  xk = (xn @ p["wk"]).reshape(B, S, N_KV_HEADS, HEAD_DIM)
  xv = (xn @ p["wv"]).reshape(B, S, N_KV_HEADS, HEAD_DIM)
  xq = _rope_ref(xq, cos_h, sin_h)
  xk = _rope_ref(xk, cos_h, sin_h)

  cache_k = cache_k.at[:, start_pos:start_pos + S].set(xk)
  cache_v = cache_v.at[:, start_pos:start_pos + S].set(xv)
  keys = jnp.repeat(cache_k[:, :start_pos + S], N_REP, axis=2)
  vals = jnp.repeat(cache_v[:, :start_pos + S], N_REP, axis=2)

  q = xq.transpose(0, 2, 1, 3)
  k = keys.transpose(0, 2, 1, 3)
  v = vals.transpose(0, 2, 1, 3)
  scores = jnp.einsum("bhqd,bhkd->bhqk", q, k) / math.sqrt(HEAD_DIM)
  scores = scores + mask[None, None]
  probs = jax.nn.softmax(scores, axis=-1)
  o = jnp.einsum("bhqk,bhkd->bhqd", probs, v)
  o = o.transpose(0, 2, 1, 3).reshape(B, S, N_HEADS * HEAD_DIM)

  h = x + o @ p["wo"]
  hn = rms(h, p["ln2"])
  ff = (jax.nn.silu(hn @ p["w1"]) * (hn @ p["w3"])) @ p["w2"]
  return h + ff, cache_k, cache_v


# ---------------------------------------- main ------------------------------------------
if __name__ == "__main__":
  B, S = MAX_BATCH, 8
  start_pos = 0
  kv_len = start_pos + S

  key = jax.random.PRNGKey(0)
  ks = jax.random.split(key, 8)

  def init(k, shape):
    return 0.02 * jax.random.normal(k, shape, jnp.float32)

  params = {
      "ln1": jnp.ones((1, DIM), jnp.float32),
      "ln2": jnp.ones((1, DIM), jnp.float32),
      "wq": init(ks[0], (DIM, N_HEADS * HEAD_DIM)),
      "wk": init(ks[1], (DIM, N_KV_HEADS * HEAD_DIM)),
      "wv": init(ks[2], (DIM, N_KV_HEADS * HEAD_DIM)),
      "wo": init(ks[3], (N_HEADS * HEAD_DIM, DIM)),
      "w1": init(ks[4], (DIM, HIDDEN_DIM)),
      "w3": init(ks[5], (DIM, HIDDEN_DIM)),
      "w2": init(ks[6], (HIDDEN_DIM, DIM)),
  }
  x = jax.random.normal(ks[7], (B, S, DIM), jnp.float32)

  # reference caches (separate K/V, per-head layout); kernel cache (merged, lane-packed)
  cache_k = jnp.zeros((B, MAX_SEQ_LEN, N_KV_HEADS, HEAD_DIM), jnp.float32)
  cache_v = jnp.zeros((B, MAX_SEQ_LEN, N_KV_HEADS, HEAD_DIM), jnp.float32)
  cache_kv = jnp.zeros((B, MAX_SEQ_LEN, 2 * KV_DIM), jnp.float32)

  # one-time prep (fused bf16 weights, batch-tiled RoPE tables) — NOT in the per-call path
  consts = prepare_block_constants(params, start_pos, S, B)

  # rotary tables + causal mask for the reference
  inv_freq = 1.0 / (ROPE_THETA ** (jnp.arange(0, HEAD_DIM, 2, dtype=jnp.float32) / HEAD_DIM))
  t = jnp.arange(MAX_SEQ_LEN, dtype=jnp.float32)
  freqs = jnp.outer(t, inv_freq)
  cos_h = jnp.cos(freqs)[start_pos:start_pos + S]
  sin_h = jnp.sin(freqs)[start_pos:start_pos + S]
  row = jnp.arange(S)[:, None]
  col = jnp.arange(kv_len)[None, :]
  mask = jnp.where(col > row + start_pos, -1e9, 0.0).astype(jnp.float32)

  ref_out, ref_ck, ref_cv = ref_forward(
      x, params, cache_k, cache_v, start_pos, cos_h, sin_h, mask)

  out, ckv_new = transformer_block(x, consts, cache_kv, start_pos)
  out = jax.block_until_ready(out)

  ck_new = ckv_new[..., :KV_DIM].reshape(B, MAX_SEQ_LEN, N_KV_HEADS, HEAD_DIM)
  cv_new = ckv_new[..., KV_DIM:].reshape(B, MAX_SEQ_LEN, N_KV_HEADS, HEAD_DIM)

  # Kernel uses bf16 MXU operands with f32 accumulation -> compare to the f32
  # reference at bf16-matmul tolerance.
  assert jnp.allclose(out, ref_out, atol=1e-2, rtol=1e-2), (
      "mismatch vs reference: max abs diff = "
      f"{float(jnp.max(jnp.abs(out - ref_out)))}")
  assert jnp.allclose(ck_new, ref_ck, atol=1e-2, rtol=1e-2), (
      "cache_k mismatch: max abs diff = "
      f"{float(jnp.max(jnp.abs(ck_new - ref_ck)))}")
  assert jnp.allclose(cv_new, ref_cv, atol=1e-2, rtol=1e-2), (
      "cache_v mismatch: max abs diff = "
      f"{float(jnp.max(jnp.abs(cv_new - ref_cv)))}")

  print("KERNEL_OK")
</pallas_src>

<mosaic_0001>
module attributes {stable_mosaic.version = 11 : i64} {
  func.func @_transformer_block_kernel(%arg0: i32, %arg1: memref<16x128xf32, #tpu.memory_space<vmem>>, %arg2: memref<1x128xf32, #tpu.memory_space<vmem>>, %arg3: memref<1x128xf32, #tpu.memory_space<vmem>>, %arg4: memref<128x256xbf16, #tpu.memory_space<vmem>>, %arg5: memref<128x128xbf16, #tpu.memory_space<vmem>>, %arg6: memref<128x512xbf16, #tpu.memory_space<vmem>>, %arg7: memref<256x128xbf16, #tpu.memory_space<vmem>>, %arg8: memref<16x128xf32, #tpu.memory_space<vmem>>, %arg9: memref<16x128xf32, #tpu.memory_space<vmem>>, %arg10: memref<16x128xf32, #tpu.memory_space<vmem>>, %arg11: memref<2x8x128xf32, #tpu.memory_space<vmem>>, %arg12: memref<16x128xf32, #tpu.memory_space<vmem>>, %arg13: memref<2x8x128xf32, #tpu.memory_space<vmem>>) attributes {dimension_semantics = [#tpu.dimension_semantics<arbitrary>], iteration_bounds = array<i64: 1>, scalar_prefetch = 0 : i64, scratch_operands = 0 : i64, tpu.core_type = #tpu.core_type<tc>, window_params = [{pipeline_mode = #tpu.pipeline_mode<synchronous>, transform_indices = @transform_0, window_bounds = array<i64: 16, 128>}, {pipeline_mode = #tpu.pipeline_mode<synchronous>, transform_indices = @transform_1, window_bounds = array<i64: 1, 128>}, {pipeline_mode = #tpu.pipeline_mode<synchronous>, transform_indices = @transform_2, window_bounds = array<i64: 1, 128>}, {pipeline_mode = #tpu.pipeline_mode<synchronous>, transform_indices = @transform_3, window_bounds = array<i64: 128, 256>}, {pipeline_mode = #tpu.pipeline_mode<synchronous>, transform_indices = @transform_4, window_bounds = array<i64: 128, 128>}, {pipeline_mode = #tpu.pipeline_mode<synchronous>, transform_indices = @transform_5, window_bounds = array<i64: 128, 512>}, {pipeline_mode = #tpu.pipeline_mode<synchronous>, transform_indices = @transform_6, window_bounds = array<i64: 256, 128>}, {pipeline_mode = #tpu.pipeline_mode<synchronous>, transform_indices = @transform_7, window_bounds = array<i64: 16, 128>}, {pipeline_mode = #tpu.pipeline_mode<synchronous>, transform_indices = @transform_8, window_bounds = array<i64: 16, 128>}, {pipeline_mode = #tpu.pipeline_mode<synchronous>, transform_indices = @transform_9, window_bounds = array<i64: 16, 128>}, {transform_indices = @transform_10, window_bounds = array<i64: 2, 8, 128>}, {pipeline_mode = #tpu.pipeline_mode<synchronous>, transform_indices = @transform_11, window_bounds = array<i64: 16, 128>}, {transform_indices = @transform_12, window_bounds = array<i64: 2, 8, 128>}]} {
    %c0 = arith.constant 0 : index
    %c0_0 = arith.constant 0 : index
    %0 = vector.load %arg1[%c0, %c0_0] : memref<16x128xf32, #tpu.memory_space<vmem>>, vector<16x128xf32>
    %c0_1 = arith.constant 0 : index
    %c0_2 = arith.constant 0 : index
    %1 = vector.load %arg2[%c0_1, %c0_2] : memref<1x128xf32, #tpu.memory_space<vmem>>, vector<1x128xf32>
    %2 = arith.mulf %0, %0 : vector<16x128xf32>
    %cst = arith.constant dense<0.000000e+00> : vector<16xf32>
    %3 = vector.multi_reduction <add>, %2, %cst [1] : vector<16x128xf32> to vector<16xf32>
    %4 = vector.shape_cast %3 : vector<16xf32> to vector<16x1xf32>
    %cst_3 = arith.constant 1.280000e+02 : f32
    %5 = vector.broadcast %cst_3 : f32 to vector<16x1xf32>
    %6 = arith.divf %4, %5 : vector<16x1xf32>
    %cst_4 = arith.constant 9.99999974E-6 : f32
    %7 = vector.broadcast %cst_4 : f32 to vector<16x1xf32>
    %8 = arith.addf %6, %7 : vector<16x1xf32>
    %9 = math.rsqrt %8 : vector<16x1xf32>
    %10 = vector.broadcast %9 : vector<16x1xf32> to vector<16x128xf32>
    %11 = arith.mulf %0, %10 : vector<16x128xf32>
    %12 = vector.broadcast %1 : vector<1x128xf32> to vector<16x128xf32>
    %13 = arith.mulf %11, %12 : vector<16x128xf32>
    %14 = arith.truncf %13 : vector<16x128xf32> to vector<16x128xbf16>
    %c0_5 = arith.constant 0 : index
    %c0_6 = arith.constant 0 : index
    %15 = vector.load %arg4[%c0_5, %c0_6] : memref<128x256xbf16, #tpu.memory_space<vmem>>, vector<128x256xbf16>
    %cst_7 = arith.constant dense<0.000000e+00> : vector<16x256xf32>
    %16 = tpu.matmul %14, %15, %cst_7 {dimension_numbers = #tpu.dot_dimension_numbers<[1], [0], [0], [1], [0, 0, 1, 1], [], []>} : vector<16x128xbf16>, vector<128x256xbf16>, vector<16x256xf32> -> vector<16x256xf32>
    %17 = vector.extract_strided_slice %16 {offsets = [0, 0], sizes = [16, 128], strides = [1, 1]} : vector<16x256xf32> to vector<16x128xf32>
    %18 = vector.extract_strided_slice %16 {offsets = [0, 128], sizes = [16, 64], strides = [1, 1]} : vector<16x256xf32> to vector<16x64xf32>
    %19 = vector.extract_strided_slice %16 {offsets = [0, 192], sizes = [16, 64], strides = [1, 1]} : vector<16x256xf32> to vector<16x64xf32>
    %c0_8 = arith.constant 0 : index
    %c0_9 = arith.constant 0 : index
    %20 = vector.load %arg8[%c0_8, %c0_9] : memref<16x128xf32, #tpu.memory_space<vmem>>, vector<16x128xf32>
    %c0_10 = arith.constant 0 : index
    %c0_11 = arith.constant 0 : index
    %21 = vector.load %arg9[%c0_10, %c0_11] : memref<16x128xf32, #tpu.memory_space<vmem>>, vector<16x128xf32>
    %c0_12 = arith.constant 0 : index
    %c0_13 = arith.constant 0 : index
    %22 = vector.load %arg10[%c0_12, %c0_13] : memref<16x128xf32, #tpu.memory_space<vmem>>, vector<16x128xf32>
    %c127_i32 = arith.constant 127 : i32
    %23 = tpu.dynamic_rotate %17 by %c127_i32 dim 1 : vector<16x128xf32>, i32 -> vector<16x128xf32>
    %c1_i32 = arith.constant 1 : i32
    %24 = tpu.dynamic_rotate %17 by %c1_i32 dim 1 : vector<16x128xf32>, i32 -> vector<16x128xf32>
    %25 = arith.mulf %17, %20 : vector<16x128xf32>
    %26 = arith.mulf %23, %21 : vector<16x128xf32>
    %27 = arith.addf %25, %26 : vector<16x128xf32>
    %28 = arith.mulf %24, %22 : vector<16x128xf32>
    %29 = arith.addf %27, %28 : vector<16x128xf32>
    %30 = vector.extract_strided_slice %20 {offsets = [0, 0], sizes = [16, 64], strides = [1, 1]} : vector<16x128xf32> to vector<16x64xf32>
    %31 = vector.extract_strided_slice %21 {offsets = [0, 0], sizes = [16, 64], strides = [1, 1]} : vector<16x128xf32> to vector<16x64xf32>
    %32 = vector.extract_strided_slice %22 {offsets = [0, 0], sizes = [16, 64], strides = [1, 1]} : vector<16x128xf32> to vector<16x64xf32>
    %c63_i32 = arith.constant 63 : i32
    %33 = tpu.dynamic_rotate %18 by %c63_i32 dim 1 : vector<16x64xf32>, i32 -> vector<16x64xf32>
    %c1_i32_14 = arith.constant 1 : i32
    %34 = tpu.dynamic_rotate %18 by %c1_i32_14 dim 1 : vector<16x64xf32>, i32 -> vector<16x64xf32>
    %35 = arith.mulf %18, %30 : vector<16x64xf32>
    %36 = arith.mulf %33, %31 : vector<16x64xf32>
    %37 = arith.addf %35, %36 : vector<16x64xf32>
    %38 = arith.mulf %34, %32 : vector<16x64xf32>
    %39 = arith.addf %37, %38 : vector<16x64xf32>
    %40 = tpu.concatenate %39, %19 in 1 : vector<16x64xf32>, vector<16x64xf32> -> vector<16x128xf32>
    %41 = vector.extract_strided_slice %40 {offsets = [0, 0], sizes = [8, 128], strides = [1, 1]} : vector<16x128xf32> to vector<8x128xf32>
    %c0_15 = arith.constant 0 : index
    %c0_16 = arith.constant 0 : index
    %c0_17 = arith.constant 0 : index
    %42 = vector.load %arg13[%c0_15, %c0_16, %c0_17] : memref<2x8x128xf32, #tpu.memory_space<vmem>>, vector<1x8x128xf32>
    %43 = vector.shape_cast %42 : vector<1x8x128xf32> to vector<8x128xf32>
    %44 = vector.shape_cast %41 : vector<8x128xf32> to vector<1x8x128xf32>
    tpu.vector_store %arg13[%c0_15, %c0_16, %c0_17], %44 {strides = array<i32>} : memref<2x8x128xf32, #tpu.memory_space<vmem>>, vector<1x8x128xf32>,
    %45 = vector.extract_strided_slice %40 {offsets = [8, 0], sizes = [8, 128], strides = [1, 1]} : vector<16x128xf32> to vector<8x128xf32>
    %c1 = arith.constant 1 : index
    %c0_18 = arith.constant 0 : index
    %c0_19 = arith.constant 0 : index
    %46 = vector.load %arg13[%c1, %c0_18, %c0_19] : memref<2x8x128xf32, #tpu.memory_space<vmem>>, vector<1x8x128xf32>
    %47 = vector.shape_cast %46 : vector<1x8x128xf32> to vector<8x128xf32>
    %48 = vector.shape_cast %45 : vector<8x128xf32> to vector<1x8x128xf32>
    tpu.vector_store %arg13[%c1, %c0_18, %c0_19], %48 {strides = array<i32>} : memref<2x8x128xf32, #tpu.memory_space<vmem>>, vector<1x8x128xf32>,
    %49 = tpu.iota {dimensions = array<i32: 0>} : vector<16x8xi32>
    %c8_i32 = arith.constant 8 : i32
    %c0_i32 = arith.constant 0 : i32
    %50 = arith.cmpi eq, %c8_i32, %c0_i32 : i32
    %c1_i32_20 = arith.constant 1 : i32
    %51 = arith.select %50, %c1_i32_20, %c8_i32 : i32
    %52 = vector.broadcast %51 : i32 to vector<16x8xi32>
    %53 = arith.remsi %49, %52 : vector<16x8xi32>
    %c0_i32_21 = arith.constant 0 : i32
    %54 = vector.broadcast %c0_i32_21 : i32 to vector<16x8xi32>
    %55 = arith.cmpi ne, %53, %54 : vector<16x8xi32>
    %c0_i32_22 = arith.constant 0 : i32
    %56 = vector.broadcast %c0_i32_22 : i32 to vector<16x8xi32>
    %57 = arith.cmpi slt, %53, %56 : vector<16x8xi32>
    %c0_i32_23 = arith.constant 0 : i32
    %58 = arith.cmpi slt, %51, %c0_i32_23 : i32
    %59 = vector.broadcast %58 : i1 to vector<16x8xi1>
    %60 = vector.broadcast %59 : vector<16x8xi1> to vector<16x8xi1>
    %61 = arith.xori %57, %60 : vector<16x8xi1>
    %62 = arith.andi %61, %55 : vector<16x8xi1>
    %63 = vector.broadcast %51 : i32 to vector<16x8xi32>
    %64 = arith.addi %53, %63 : vector<16x8xi32>
    %65 = arith.select %62, %64, %53 : vector<16x8xi1>, vector<16x8xi32>
    %66 = tpu.iota {dimensions = array<i32: 1>} : vector<16x8xi32>
    %c0_i32_24 = arith.constant 0 : i32
    %67 = vector.broadcast %c0_i32_24 : i32 to vector<16x8xi32>
    %68 = arith.addi %65, %67 : vector<16x8xi32>
    %69 = arith.cmpi sgt, %66, %68 : vector<16x8xi32>
    %cst_25 = arith.constant -1.000000e+09 : f32
    %cst_26 = arith.constant 0.000000e+00 : f32
    %70 = vector.broadcast %cst_25 : f32 to vector<16x8xf32>
    %71 = vector.broadcast %cst_26 : f32 to vector<16x8xf32>
    %72 = arith.select %69, %70, %71 : vector<16x8xi1>, vector<16x8xf32>
    %73 = vector.extract_strided_slice %29 {offsets = [0, 0], sizes = [8, 128], strides = [1, 1]} : vector<16x128xf32> to vector<8x128xf32>
    %74 = vector.extract_strided_slice %39 {offsets = [0, 0], sizes = [8, 64], strides = [1, 1]} : vector<16x64xf32> to vector<8x64xf32>
    %75 = vector.extract_strided_slice %19 {offsets = [0, 0], sizes = [8, 64], strides = [1, 1]} : vector<16x64xf32> to vector<8x64xf32>
    %76 = vector.extract_strided_slice %73 {offsets = [0, 0], sizes = [8, 32], strides = [1, 1]} : vector<8x128xf32> to vector<8x32xf32>
    %77 = vector.extract_strided_slice %73 {offsets = [0, 32], sizes = [8, 32], strides = [1, 1]} : vector<8x128xf32> to vector<8x32xf32>
    %78 = tpu.concatenate %76, %77 in 0 : vector<8x32xf32>, vector<8x32xf32> -> vector<16x32xf32>
    %79 = vector.extract_strided_slice %74 {offsets = [0, 0], sizes = [8, 32], strides = [1, 1]} : vector<8x64xf32> to vector<8x32xf32>
    %80 = vector.extract_strided_slice %75 {offsets = [0, 0], sizes = [8, 32], strides = [1, 1]} : vector<8x64xf32> to vector<8x32xf32>
    %cst_27 = arith.constant dense<0.000000e+00> : vector<16x8xf32>
    %81 = tpu.matmul %78, %79, %cst_27 {dimension_numbers = #tpu.dot_dimension_numbers<[1], [1], [0], [0], [0, 0, 1, 0], [], []>} : vector<16x32xf32>, vector<8x32xf32>, vector<16x8xf32> -> vector<16x8xf32>
    %cst_28 = arith.constant 0.176776692 : f32
    %82 = vector.broadcast %cst_28 : f32 to vector<16x8xf32>
    %83 = arith.mulf %81, %82 : vector<16x8xf32>
    %84 = arith.addf %83, %72 : vector<16x8xf32>
    %cst_29 = arith.constant dense<0xFF800000> : vector<16xf32>
    %85 = vector.multi_reduction <maximumf>, %84, %cst_29 [1] : vector<16x8xf32> to vector<16xf32>
    %86 = vector.shape_cast %85 : vector<16xf32> to vector<16x1xf32>
    %87 = vector.broadcast %86 : vector<16x1xf32> to vector<16x8xf32>
    %88 = arith.subf %84, %87 : vector<16x8xf32>
    %89 = math.exp %88 : vector<16x8xf32>
    %cst_30 = arith.constant dense<0.000000e+00> : vector<16xf32>
    %90 = vector.multi_reduction <add>, %89, %cst_30 [1] : vector<16x8xf32> to vector<16xf32>
    %91 = vector.shape_cast %90 : vector<16xf32> to vector<16x1xf32>
    %cst_31 = arith.constant dense<0.000000e+00> : vector<16x32xf32>
    %92 = tpu.matmul %89, %80, %cst_31 {dimension_numbers = #tpu.dot_dimension_numbers<[1], [0], [0], [1], [0, 0, 1, 1], [], []>} : vector<16x8xf32>, vector<8x32xf32>, vector<16x32xf32> -> vector<16x32xf32>
    %93 = tpu.reciprocal %91 {approx = true} : vector<16x1xf32> -> vector<16x1xf32>
    %94 = vector.broadcast %93 : vector<16x1xf32> to vector<16x32xf32>
    %95 = arith.mulf %92, %94 : vector<16x32xf32>
    %96 = vector.extract_strided_slice %95 {offsets = [0, 0], sizes = [8, 32], strides = [1, 1]} : vector<16x32xf32> to vector<8x32xf32>
    %97 = vector.extract_strided_slice %95 {offsets = [8, 0], sizes = [8, 32], strides = [1, 1]} : vector<16x32xf32> to vector<8x32xf32>
    %98 = vector.extract_strided_slice %73 {offsets = [0, 64], sizes = [8, 32], strides = [1, 1]} : vector<8x128xf32> to vector<8x32xf32>
    %99 = vector.extract_strided_slice %73 {offsets = [0, 96], sizes = [8, 32], strides = [1, 1]} : vector<8x128xf32> to vector<8x32xf32>
    %100 = tpu.concatenate %98, %99 in 0 : vector<8x32xf32>, vector<8x32xf32> -> vector<16x32xf32>
    %101 = vector.extract_strided_slice %74 {offsets = [0, 32], sizes = [8, 32], strides = [1, 1]} : vector<8x64xf32> to vector<8x32xf32>
    %102 = vector.extract_strided_slice %75 {offsets = [0, 32], sizes = [8, 32], strides = [1, 1]} : vector<8x64xf32> to vector<8x32xf32>
    %cst_32 = arith.constant dense<0.000000e+00> : vector<16x8xf32>
    %103 = tpu.matmul %100, %101, %cst_32 {dimension_numbers = #tpu.dot_dimension_numbers<[1], [1], [0], [0], [0, 0, 1, 0], [], []>} : vector<16x32xf32>, vector<8x32xf32>, vector<16x8xf32> -> vector<16x8xf32>
    %cst_33 = arith.constant 0.176776692 : f32
    %104 = vector.broadcast %cst_33 : f32 to vector<16x8xf32>
    %105 = arith.mulf %103, %104 : vector<16x8xf32>
    %106 = arith.addf %105, %72 : vector<16x8xf32>
    %cst_34 = arith.constant dense<0xFF800000> : vector<16xf32>
    %107 = vector.multi_reduction <maximumf>, %106, %cst_34 [1] : vector<16x8xf32> to vector<16xf32>
    %108 = vector.shape_cast %107 : vector<16xf32> to vector<16x1xf32>
    %109 = vector.broadcast %108 : vector<16x1xf32> to vector<16x8xf32>
    %110 = arith.subf %106, %109 : vector<16x8xf32>
    %111 = math.exp %110 : vector<16x8xf32>
    %cst_35 = arith.constant dense<0.000000e+00> : vector<16xf32>
    %112 = vector.multi_reduction <add>, %111, %cst_35 [1] : vector<16x8xf32> to vector<16xf32>
    %113 = vector.shape_cast %112 : vector<16xf32> to vector<16x1xf32>
    %cst_36 = arith.constant dense<0.000000e+00> : vector<16x32xf32>
    %114 = tpu.matmul %111, %102, %cst_36 {dimension_numbers = #tpu.dot_dimension_numbers<[1], [0], [0], [1], [0, 0, 1, 1], [], []>} : vector<16x8xf32>, vector<8x32xf32>, vector<16x32xf32> -> vector<16x32xf32>
    %115 = tpu.reciprocal %113 {approx = true} : vector<16x1xf32> -> vector<16x1xf32>
    %116 = vector.broadcast %115 : vector<16x1xf32> to vector<16x32xf32>
    %117 = arith.mulf %114, %116 : vector<16x32xf32>
    %118 = vector.extract_strided_slice %117 {offsets = [0, 0], sizes = [8, 32], strides = [1, 1]} : vector<16x32xf32> to vector<8x32xf32>
    %119 = vector.extract_strided_slice %117 {offsets = [8, 0], sizes = [8, 32], strides = [1, 1]} : vector<16x32xf32> to vector<8x32xf32>
    %120 = tpu.concatenate %96, %97, %118, %119 in 1 : vector<8x32xf32>, vector<8x32xf32>, vector<8x32xf32>, vector<8x32xf32> -> vector<8x128xf32>
    %121 = vector.extract_strided_slice %29 {offsets = [8, 0], sizes = [8, 128], strides = [1, 1]} : vector<16x128xf32> to vector<8x128xf32>
    %122 = vector.extract_strided_slice %39 {offsets = [8, 0], sizes = [8, 64], strides = [1, 1]} : vector<16x64xf32> to vector<8x64xf32>
    %123 = vector.extract_strided_slice %19 {offsets = [8, 0], sizes = [8, 64], strides = [1, 1]} : vector<16x64xf32> to vector<8x64xf32>
    %124 = vector.extract_strided_slice %121 {offsets = [0, 0], sizes = [8, 32], strides = [1, 1]} : vector<8x128xf32> to vector<8x32xf32>
    %125 = vector.extract_strided_slice %121 {offsets = [0, 32], sizes = [8, 32], strides = [1, 1]} : vector<8x128xf32> to vector<8x32xf32>
    %126 = tpu.concatenate %124, %125 in 0 : vector<8x32xf32>, vector<8x32xf32> -> vector<16x32xf32>
    %127 = vector.extract_strided_slice %122 {offsets = [0, 0], sizes = [8, 32], strides = [1, 1]} : vector<8x64xf32> to vector<8x32xf32>
    %128 = vector.extract_strided_slice %123 {offsets = [0, 0], sizes = [8, 32], strides = [1, 1]} : vector<8x64xf32> to vector<8x32xf32>
    %cst_37 = arith.constant dense<0.000000e+00> : vector<16x8xf32>
    %129 = tpu.matmul %126, %127, %cst_37 {dimension_numbers = #tpu.dot_dimension_numbers<[1], [1], [0], [0], [0, 0, 1, 0], [], []>} : vector<16x32xf32>, vector<8x32xf32>, vector<16x8xf32> -> vector<16x8xf32>
    %cst_38 = arith.constant 0.176776692 : f32
    %130 = vector.broadcast %cst_38 : f32 to vector<16x8xf32>
    %131 = arith.mulf %129, %130 : vector<16x8xf32>
    %132 = arith.addf %131, %72 : vector<16x8xf32>
    %cst_39 = arith.constant dense<0xFF800000> : vector<16xf32>
    %133 = vector.multi_reduction <maximumf>, %132, %cst_39 [1] : vector<16x8xf32> to vector<16xf32>
    %134 = vector.shape_cast %133 : vector<16xf32> to vector<16x1xf32>
    %135 = vector.broadcast %134 : vector<16x1xf32> to vector<16x8xf32>
    %136 = arith.subf %132, %135 : vector<16x8xf32>
    %137 = math.exp %136 : vector<16x8xf32>
    %cst_40 = arith.constant dense<0.000000e+00> : vector<16xf32>
    %138 = vector.multi_reduction <add>, %137, %cst_40 [1] : vector<16x8xf32> to vector<16xf32>
    %139 = vector.shape_cast %138 : vector<16xf32> to vector<16x1xf32>
    %cst_41 = arith.constant dense<0.000000e+00> : vector<16x32xf32>
    %140 = tpu.matmul %137, %128, %cst_41 {dimension_numbers = #tpu.dot_dimension_numbers<[1], [0], [0], [1], [0, 0, 1, 1], [], []>} : vector<16x8xf32>, vector<8x32xf32>, vector<16x32xf32> -> vector<16x32xf32>
    %141 = tpu.reciprocal %139 {approx = true} : vector<16x1xf32> -> vector<16x1xf32>
    %142 = vector.broadcast %141 : vector<16x1xf32> to vector<16x32xf32>
    %143 = arith.mulf %140, %142 : vector<16x32xf32>
    %144 = vector.extract_strided_slice %143 {offsets = [0, 0], sizes = [8, 32], strides = [1, 1]} : vector<16x32xf32> to vector<8x32xf32>
    %145 = vector.extract_strided_slice %143 {offsets = [8, 0], sizes = [8, 32], strides = [1, 1]} : vector<16x32xf32> to vector<8x32xf32>
    %146 = vector.extract_strided_slice %121 {offsets = [0, 64], sizes = [8, 32], strides = [1, 1]} : vector<8x128xf32> to vector<8x32xf32>
    %147 = vector.extract_strided_slice %121 {offsets = [0, 96], sizes = [8, 32], strides = [1, 1]} : vector<8x128xf32> to vector<8x32xf32>
    %148 = tpu.concatenate %146, %147 in 0 : vector<8x32xf32>, vector<8x32xf32> -> vector<16x32xf32>
    %149 = vector.extract_strided_slice %122 {offsets = [0, 32], sizes = [8, 32], strides = [1, 1]} : vector<8x64xf32> to vector<8x32xf32>
    %150 = vector.extract_strided_slice %123 {offsets = [0, 32], sizes = [8, 32], strides = [1, 1]} : vector<8x64xf32> to vector<8x32xf32>
    %cst_42 = arith.constant dense<0.000000e+00> : vector<16x8xf32>
    %151 = tpu.matmul %148, %149, %cst_42 {dimension_numbers = #tpu.dot_dimension_numbers<[1], [1], [0], [0], [0, 0, 1, 0], [], []>} : vector<16x32xf32>, vector<8x32xf32>, vector<16x8xf32> -> vector<16x8xf32>
    %cst_43 = arith.constant 0.176776692 : f32
    %152 = vector.broadcast %cst_43 : f32 to vector<16x8xf32>
    %153 = arith.mulf %151, %152 : vector<16x8xf32>
    %154 = arith.addf %153, %72 : vector<16x8xf32>
    %cst_44 = arith.constant dense<0xFF800000> : vector<16xf32>
    %155 = vector.multi_reduction <maximumf>, %154, %cst_44 [1] : vector<16x8xf32> to vector<16xf32>
    %156 = vector.shape_cast %155 : vector<16xf32> to vector<16x1xf32>
    %157 = vector.broadcast %156 : vector<16x1xf32> to vector<16x8xf32>
    %158 = arith.subf %154, %157 : vector<16x8xf32>
    %159 = math.exp %158 : vector<16x8xf32>
    %cst_45 = arith.constant dense<0.000000e+00> : vector<16xf32>
    %160 = vector.multi_reduction <add>, %159, %cst_45 [1] : vector<16x8xf32> to vector<16xf32>
    %161 = vector.shape_cast %160 : vector<16xf32> to vector<16x1xf32>
    %cst_46 = arith.constant dense<0.000000e+00> : vector<16x32xf32>
    %162 = tpu.matmul %159, %150, %cst_46 {dimension_numbers = #tpu.dot_dimension_numbers<[1], [0], [0], [1], [0, 0, 1, 1], [], []>} : vector<16x8xf32>, vector<8x32xf32>, vector<16x32xf32> -> vector<16x32xf32>
    %163 = tpu.reciprocal %161 {approx = true} : vector<16x1xf32> -> vector<16x1xf32>
    %164 = vector.broadcast %163 : vector<16x1xf32> to vector<16x32xf32>
    %165 = arith.mulf %162, %164 : vector<16x32xf32>
    %166 = vector.extract_strided_slice %165 {offsets = [0, 0], sizes = [8, 32], strides = [1, 1]} : vector<16x32xf32> to vector<8x32xf32>
    %167 = vector.extract_strided_slice %165 {offsets = [8, 0], sizes = [8, 32], strides = [1, 1]} : vector<16x32xf32> to vector<8x32xf32>
    %168 = tpu.concatenate %144, %145, %166, %167 in 1 : vector<8x32xf32>, vector<8x32xf32>, vector<8x32xf32>, vector<8x32xf32> -> vector<8x128xf32>
    %169 = tpu.concatenate %120, %168 in 0 : vector<8x128xf32>, vector<8x128xf32> -> vector<16x128xf32>
    %170 = arith.truncf %169 : vector<16x128xf32> to vector<16x128xbf16>
    %c0_47 = arith.constant 0 : index
    %c0_48 = arith.constant 0 : index
    %171 = vector.load %arg5[%c0_47, %c0_48] : memref<128x128xbf16, #tpu.memory_space<vmem>>, vector<128x128xbf16>
    %cst_49 = arith.constant dense<0.000000e+00> : vector<16x128xf32>
    %172 = tpu.matmul %170, %171, %cst_49 {dimension_numbers = #tpu.dot_dimension_numbers<[1], [0], [0], [1], [0, 0, 1, 1], [], []>} : vector<16x128xbf16>, vector<128x128xbf16>, vector<16x128xf32> -> vector<16x128xf32>
    %173 = arith.addf %0, %172 : vector<16x128xf32>
    %c0_50 = arith.constant 0 : index
    %c0_51 = arith.constant 0 : index
    %174 = vector.load %arg3[%c0_50, %c0_51] : memref<1x128xf32, #tpu.memory_space<vmem>>, vector<1x128xf32>
    %175 = arith.mulf %173, %173 : vector<16x128xf32>
    %cst_52 = arith.constant dense<0.000000e+00> : vector<16xf32>
    %176 = vector.multi_reduction <add>, %175, %cst_52 [1] : vector<16x128xf32> to vector<16xf32>
    %177 = vector.shape_cast %176 : vector<16xf32> to vector<16x1xf32>
    %cst_53 = arith.constant 1.280000e+02 : f32
    %178 = vector.broadcast %cst_53 : f32 to vector<16x1xf32>
    %179 = arith.divf %177, %178 : vector<16x1xf32>
    %cst_54 = arith.constant 9.99999974E-6 : f32
    %180 = vector.broadcast %cst_54 : f32 to vector<16x1xf32>
    %181 = arith.addf %179, %180 : vector<16x1xf32>
    %182 = math.rsqrt %181 : vector<16x1xf32>
    %183 = vector.broadcast %182 : vector<16x1xf32> to vector<16x128xf32>
    %184 = arith.mulf %173, %183 : vector<16x128xf32>
    %185 = vector.broadcast %174 : vector<1x128xf32> to vector<16x128xf32>
    %186 = arith.mulf %184, %185 : vector<16x128xf32>
    %187 = arith.truncf %186 : vector<16x128xf32> to vector<16x128xbf16>
    %c0_55 = arith.constant 0 : index
    %c0_56 = arith.constant 0 : index
    %188 = vector.load %arg6[%c0_55, %c0_56] : memref<128x512xbf16, #tpu.memory_space<vmem>>, vector<128x512xbf16>
    %cst_57 = arith.constant dense<0.000000e+00> : vector<16x512xf32>
    %189 = tpu.matmul %187, %188, %cst_57 {dimension_numbers = #tpu.dot_dimension_numbers<[1], [0], [0], [1], [0, 0, 1, 1], [], []>} : vector<16x128xbf16>, vector<128x512xbf16>, vector<16x512xf32> -> vector<16x512xf32>
    %190 = vector.extract_strided_slice %189 {offsets = [0, 0], sizes = [16, 256], strides = [1, 1]} : vector<16x512xf32> to vector<16x256xf32>
    %191 = vector.extract_strided_slice %189 {offsets = [0, 256], sizes = [16, 256], strides = [1, 1]} : vector<16x512xf32> to vector<16x256xf32>
    %192 = arith.negf %190 : vector<16x256xf32>
    %193 = math.exp %192 : vector<16x256xf32>
    %cst_58 = arith.constant 1.000000e+00 : f32
    %194 = vector.broadcast %cst_58 : f32 to vector<16x256xf32>
    %195 = arith.addf %194, %193 : vector<16x256xf32>
    %196 = arith.divf %194, %195 : vector<16x256xf32>
    %197 = arith.mulf %190, %196 : vector<16x256xf32>
    %198 = arith.mulf %197, %191 : vector<16x256xf32>
    %199 = arith.truncf %198 : vector<16x256xf32> to vector<16x256xbf16>
    %c0_59 = arith.constant 0 : index
    %c0_60 = arith.constant 0 : index
    %200 = vector.load %arg7[%c0_59, %c0_60] : memref<256x128xbf16, #tpu.memory_space<vmem>>, vector<256x128xbf16>
    %cst_61 = arith.constant dense<0.000000e+00> : vector<16x128xf32>
    %201 = tpu.matmul %199, %200, %cst_61 {dimension_numbers = #tpu.dot_dimension_numbers<[1], [0], [0], [1], [0, 0, 1, 1], [], []>} : vector<16x256xbf16>, vector<256x128xbf16>, vector<16x128xf32> -> vector<16x128xf32>
    %202 = arith.addf %173, %201 : vector<16x128xf32>
    %c0_62 = arith.constant 0 : index
    %c0_63 = arith.constant 0 : index
    %203 = vector.load %arg12[%c0_62, %c0_63] : memref<16x128xf32, #tpu.memory_space<vmem>>, vector<16x128xf32>
    tpu.vector_store %arg12[%c0_62, %c0_63], %202 {strides = array<i32>} : memref<16x128xf32, #tpu.memory_space<vmem>>, vector<16x128xf32>,
    return
  }
  func.func @transform_0(%arg0: i32) -> (i32, i32) {
    %c0_i32 = arith.constant 0 : i32
    %c0_i32_0 = arith.constant 0 : i32
    %c0_i32_1 = arith.constant 0 : i32
    return %c0_i32, %c0_i32_0 : i32, i32
  }
  func.func @transform_1(%arg0: i32) -> (i32, i32) {
    %c0_i32 = arith.constant 0 : i32
    %c0_i32_0 = arith.constant 0 : i32
    %c0_i32_1 = arith.constant 0 : i32
    return %c0_i32, %c0_i32_0 : i32, i32
  }
  func.func @transform_2(%arg0: i32) -> (i32, i32) {
    %c0_i32 = arith.constant 0 : i32
    %c0_i32_0 = arith.constant 0 : i32
    %c0_i32_1 = arith.constant 0 : i32
    return %c0_i32, %c0_i32_0 : i32, i32
  }
  func.func @transform_3(%arg0: i32) -> (i32, i32) {
    %c0_i32 = arith.constant 0 : i32
    %c0_i32_0 = arith.constant 0 : i32
    %c0_i32_1 = arith.constant 0 : i32
    return %c0_i32, %c0_i32_0 : i32, i32
  }
  func.func @transform_4(%arg0: i32) -> (i32, i32) {
    %c0_i32 = arith.constant 0 : i32
    %c0_i32_0 = arith.constant 0 : i32
    %c0_i32_1 = arith.constant 0 : i32
    return %c0_i32, %c0_i32_0 : i32, i32
  }
  func.func @transform_5(%arg0: i32) -> (i32, i32) {
    %c0_i32 = arith.constant 0 : i32
    %c0_i32_0 = arith.constant 0 : i32
    %c0_i32_1 = arith.constant 0 : i32
    return %c0_i32, %c0_i32_0 : i32, i32
  }
  func.func @transform_6(%arg0: i32) -> (i32, i32) {
    %c0_i32 = arith.constant 0 : i32
    %c0_i32_0 = arith.constant 0 : i32
    %c0_i32_1 = arith.constant 0 : i32
    return %c0_i32, %c0_i32_0 : i32, i32
  }
  func.func @transform_7(%arg0: i32) -> (i32, i32) {
    %c0_i32 = arith.constant 0 : i32
    %c0_i32_0 = arith.constant 0 : i32
    %c0_i32_1 = arith.constant 0 : i32
    return %c0_i32, %c0_i32_0 : i32, i32
  }
  func.func @transform_8(%arg0: i32) -> (i32, i32) {
    %c0_i32 = arith.constant 0 : i32
    %c0_i32_0 = arith.constant 0 : i32
    %c0_i32_1 = arith.constant 0 : i32
    return %c0_i32, %c0_i32_0 : i32, i32
  }
  func.func @transform_9(%arg0: i32) -> (i32, i32) {
    %c0_i32 = arith.constant 0 : i32
    %c0_i32_0 = arith.constant 0 : i32
    %c0_i32_1 = arith.constant 0 : i32
    return %c0_i32, %c0_i32_0 : i32, i32
  }
  func.func @transform_10(%arg0: i32) -> (i32, i32, i32) {
    %c0_i32 = arith.constant 0 : i32
    %c0_i32_0 = arith.constant 0 : i32
    %c0_i32_1 = arith.constant 0 : i32
    %c0_i32_2 = arith.constant 0 : i32
    return %c0_i32, %c0_i32_0, %c0_i32_1 : i32, i32, i32
  }
  func.func @transform_11(%arg0: i32) -> (i32, i32) {
    %c0_i32 = arith.constant 0 : i32
    %c0_i32_0 = arith.constant 0 : i32
    %c0_i32_1 = arith.constant 0 : i32
    return %c0_i32, %c0_i32_0 : i32, i32
  }
  func.func @transform_12(%arg0: i32) -> (i32, i32, i32) {
    %c0_i32 = arith.constant 0 : i32
    %c0_i32_0 = arith.constant 0 : i32
    %c0_i32_1 = arith.constant 0 : i32
    %c0_i32_2 = arith.constant 0 : i32
    return %c0_i32, %c0_i32_0, %c0_i32_1 : i32, i32, i32
  }
}

</mosaic_0001>

<bundles_post_ra>
// kernel: transformer_block.1
= control target key start
LH: loop header
LB: loop body
LE: loop exit
PB: predicated region body
PF: predicated region fallthrough
CT: control target
= control target key end

     0   :  { %18 = vsyncpa [#allocation3], 0  ;;  %s2861_s0 = inlined_call_operand.vmem [shape: f32[16,128], index: 0, kind: input, shape index: {}]   ;;  %s2862_s1 = inlined_call_operand.vmem [shape: f32[1,128], index: 1, kind: input, shape index: {}]   ;;  %s2863_s2 = inlined_call_operand.vmem [shape: f32[1,128], index: 2, kind: input, shape index: {}]   ;;  %s2864_s3 = inlined_call_operand.hbm [shape: bf16[128,256], index: 3, kind: input, shape index: {}]   ;;  %s2865_s4 = inlined_call_operand.hbm [shape: bf16[128,128], index: 4, kind: input, shape index: {}]   ;;  %s2866_s5 = inlined_call_operand.hbm [shape: bf16[128,512], index: 5, kind: input, shape index: {}]   ;;  %s2867_s6 = inlined_call_operand.hbm [shape: bf16[256,128], index: 6, kind: input, shape index: {}]   ;;  %s2868_s7 = inlined_call_operand.vmem [shape: f32[16,128], index: 7, kind: input, shape index: {}]   ;;  %s2869_s8 = inlined_call_operand.vmem [shape: f32[16,128], index: 8, kind: input, shape index: {}]   ;;  %s2870_s9 = inlined_call_operand.hbm [shape: f32[16,128], index: 9, kind: input, shape index: {}]   ;;  %s2871_s10 = inlined_call_operand.vmem [shape: f32[2,16,128], index: 10, kind: input, shape index: {}, may-alias: {10,12}]   ;;  %s2872_s11 = inlined_call_operand.hbm [shape: f32[16,128], index: 11, kind: output, shape index: {0}]   ;;  %s2873_s12 = inlined_call_operand.vmem [shape: f32[2,16,128], index: 12, kind: output, shape index: {1}, may-alias: {10,12}]  }
   0x1   :  { %19 = vsyncpa [#allocation6], 0 }
   0x2   :  { %20 = vsyncpa [#allocation9], 0 }
   0x3   :  { %21 = vsyncpa [#allocation4], 0  ;;  %s2478_s21 = smov [#allocation5]   ;;  %s2338_s25 = scalar_lea.hbm %s2865_s4, 1024 }
   0x4   :  { %s45_s22 = sshll.u32 %s2478_s21, 4  ;;  %p2339_p0 = scmp.ne.s32.totalorder %s2865_s4, %s2338_s25  ;;  %s46_s22 = int_to_ptr.vmem [resolvable:$true] %s45_s22 }
   0x5   :  { %p2342_p1 = scmp.lt.u32.totalorder %s2338_s25, %s2865_s4 }
   0x7   :  { %p2344_p2 = pnand %p2342_p1, %p2339_p0 }
   0x9   :  { %2347 = shalt.err (!%p2344_p2)
}
   0xa   :  { %s2348_s29 = scalar_lea.vmem %s46_s22, 1024  ;;  %p2353_p4 = scmp.lt.s32.totalorder %s46_s22, %s46_s22 }
   0xb   :  { %p2349_p3 = scmp.ne.s32.totalorder %s46_s22, %s2348_s29  ;;  %p2354_p5 = scmp.lt.s32.totalorder %s2348_s29, %s2348_s29 }
   0xd   :  { %p2355_p6 = por %p2354_p5, %p2353_p4 }
   0xf   :  { %p2356_p7 = pnand %p2355_p6, %p2349_p3 }
  0x11   :  { %2359 = shalt.err (!%p2356_p7)
}
  0x12   :  { %s2479_s30 = smov 64   ;;  %s2480_s13 = smov 4  }
  0x13   :  { %51 = dma.hbm_to_vmem [thread:$0]  %s2865_s4, 1024, %s46_s22, [#allocation6], %s2479_s30, %s2479_s30, %s2480_s13  }
  0x14   :  { %s2481_s16 = smov [#allocation8]   ;;  %s2482_s18 = smov [#allocation2]  }
  0x15   :  { %s69_s17 = sshll.u32 %s2481_s16, 4  ;;  %s33_s19 = sshll.u32 %s2482_s18, 4  ;;  %s70_s17 = int_to_ptr.vmem [resolvable:$true] %s69_s17  ;;  %s34_s19 = int_to_ptr.vmem [resolvable:$true] %s33_s19 }
  0x16   :  { %s2360_s23 = scalar_lea.hbm %s2867_s6, 2048 }
  0x17   :  { %p2361_p8 = scmp.ne.s32.totalorder %s2867_s6, %s2360_s23  ;;  %p2364_p9 = scmp.lt.u32.totalorder %s2360_s23, %s2867_s6 }
  0x19   :  { %p2366_p10 = pnand %p2364_p9, %p2361_p8 }
  0x1b   :  { %2369 = shalt.err (!%p2366_p10)
}
  0x1c   :  { %s2370_s4 = scalar_lea.vmem %s70_s17, 2048  ;;  %p2375_p12 = scmp.lt.s32.totalorder %s70_s17, %s70_s17 }
  0x1d   :  { %p2371_p11 = scmp.ne.s32.totalorder %s70_s17, %s2370_s4  ;;  %p2376_p13 = scmp.lt.s32.totalorder %s2370_s4, %s2370_s4 }
  0x1f   :  { %p2377_p0 = por %p2376_p13, %p2375_p12 }
  0x21   :  { %p2378_p1 = pnand %p2377_p0, %p2371_p11 }
  0x23   :  { %2381 = shalt.err (!%p2378_p1)
}
  0x24   :  { %75 = dma.hbm_to_vmem [thread:$0]  %s2867_s6, 2048, %s70_s17, [#allocation9], %s2479_s30, %s2479_s30, %s2480_s13  }
  0x25   :  { %s2382_s14 = scalar_lea.hbm %s2864_s3, 2048 }
  0x26   :  { %p2383_p2 = scmp.ne.s32.totalorder %s2864_s3, %s2382_s14  ;;  %p2386_p3 = scmp.lt.u32.totalorder %s2382_s14, %s2864_s3 }
  0x28   :  { %p2388_p4 = pnand %p2386_p3, %p2383_p2 }
  0x2a   :  { %2391 = shalt.err (!%p2388_p4)
}
  0x2b   :  { %s2392_s21 = scalar_lea.vmem %s34_s19, 2048  ;;  %p2397_p6 = scmp.lt.s32.totalorder %s34_s19, %s34_s19 }
  0x2c   :  { %p2393_p5 = scmp.ne.s32.totalorder %s34_s19, %s2392_s21  ;;  %p2398_p7 = scmp.lt.s32.totalorder %s2392_s21, %s2392_s21 }
  0x2e   :  { %p2399_p8 = por %p2398_p7, %p2397_p6 }
  0x30   :  { %p2400_p9 = pnand %p2399_p8, %p2393_p5 }
  0x32   :  { %2403 = shalt.err (!%p2400_p9)
}
  0x33   :  { %s2483_s6 = smov 128   ;;  %s2484_s13 = smov 8  }
  0x34   :  { %39 = dma.hbm_to_vmem [thread:$0]  %s2864_s3, 2048, %s34_s19, [#allocation3], %s2483_s6, %s2483_s6, %s2484_s13  }
  0x35   :  { %s2485_s24 = smov [#allocation7]   ;;  %s2404_s4 = scalar_lea.hbm %s2866_s5, 4096 }
  0x36   :  { %s57_s25 = sshll.u32 %s2485_s24, 4  ;;  %p2405_p10 = scmp.ne.s32.totalorder %s2866_s5, %s2404_s4  ;;  %s58_s25 = int_to_ptr.vmem [resolvable:$true] %s57_s25 }
  0x37   :  { %p2408_p11 = scmp.lt.u32.totalorder %s2404_s4, %s2866_s5 }
  0x39   :  { %p2410_p12 = pnand %p2408_p11, %p2405_p10 }
  0x3b   :  { %2413 = shalt.err (!%p2410_p12)
}
  0x3c   :  { %s2414_s14 = scalar_lea.vmem %s58_s25, 4096  ;;  %p2419_p0 = scmp.lt.s32.totalorder %s58_s25, %s58_s25 }
  0x3d   :  { %p2415_p13 = scmp.ne.s32.totalorder %s58_s25, %s2414_s14  ;;  %p2420_p1 = scmp.lt.s32.totalorder %s2414_s14, %s2414_s14 }
  0x3f   :  { %p2421_p2 = por %p2420_p1, %p2419_p0 }
  0x41   :  { %p2422_p3 = pnand %p2421_p2, %p2415_p13 }
  0x43   :  { %2425 = shalt.err (!%p2422_p3)
}
  0x44   :  { %s2486_s3 = smov 256   ;;  %s2487_s19 = smov 16  }
  0x45   :  { %63 = dma.hbm_to_vmem [thread:$0]  %s2866_s5, 4096, %s58_s25, [#allocation6], %s2486_s3, %s2486_s3, %s2487_s19  }
  0x46   :  { %s2488_s18 = smov [#allocation10]   ;;  %s2426_s23 = scalar_lea.hbm %s2870_s9, 256 }
  0x47   :  { %s85_s20 = sshll.u32 %s2488_s18, 4  ;;  %p2427_p4 = scmp.ne.s32.totalorder %s2870_s9, %s2426_s23  ;;  %s86_s20 = int_to_ptr.vmem [resolvable:$true] %s85_s20 }
  0x48   :  { %p2430_p5 = scmp.lt.u32.totalorder %s2426_s23, %s2870_s9 }
  0x4a   :  { %p2432_p6 = pnand %p2430_p5, %p2427_p4 }
  0x4c   :  { %2435 = shalt.err (!%p2432_p6)
}
  0x4d   :  { %s2436_s22 = scalar_lea.vmem %s86_s20, 256  ;;  %p2441_p8 = scmp.lt.s32.totalorder %s86_s20, %s86_s20 }
  0x4e   :  { %p2437_p7 = scmp.ne.s32.totalorder %s86_s20, %s2436_s22  ;;  %p2442_p9 = scmp.lt.s32.totalorder %s2436_s22, %s2436_s22 }
  0x50   :  { %p2443_p10 = por %p2442_p9, %p2441_p8 }
  0x52   :  { %p2444_p11 = pnand %p2443_p10, %p2437_p7 }
  0x54   :  { %2447 = shalt.err (!%p2444_p11)
}
  0x55   :  { %91 = dma.hbm_to_vmem [thread:$0]  %s2870_s9, 256, %s86_s20, [#allocation9], %s2483_s6, %s2483_s6, %s2484_s13  }
  0x56   :  { %2470 = dma.done.wait [#allocation3], 2048  }
  0x57   :  { %2471 = vsyncadd [#allocation3], 4294965248 }
  0x58   :  { %2472 = dma.done.wait [#allocation6], 5120  }
  0x59   :  { %2473 = vsyncadd [#allocation6], 4294962176 }
  0x5a   :  { %2474 = dma.done.wait [#allocation9], 2304  }
  0x5b   :  { %2475 = vsyncadd [#allocation9], 4294964992  ;;  %v148_v0 = vld [vmem:[%s2861_s0] sm:$0xff]  ;;  %v149_v1 = vld [vmem:[%s2861_s0 + $0x8] sm:$0xff]  ;;  %v2489_v17 = vmov 0   ;;  %s2490_s16 = smov 1  }
  0x5c   :  { %v151_v2 = vmul.f32 %v148_v0, %v148_v0  ;;  %v2184_v3 = vld [vmem:[#allocation2 + $0x4] ss:$8 sps:$4 sm:$0xff]   ;;  %v2186_v4 = vld [vmem:[#allocation2] ss:$8 sps:$4 sm:$0xff]   ;;  %v2187_v5 = vld [vmem:[#allocation2 + $0x14] ss:$8 sps:$4 sm:$0xff]   ;;  %v152_v6 = vmul.f32 %v149_v1, %v149_v1  ;;  %303 = vmatprep.mubr.bf16.mxu0 %v2489_v17 }
  0x5d   :  { %271 = vmatprep.subr.bf16.mxu0 %v2184_v3  ;;  %v2189_v7 = vld [vmem:[#allocation2 + $0x10] ss:$8 sps:$4 sm:$0xff]   ;;  %v2190_v8 = vld [vmem:[#allocation2 + $0x24] ss:$8 sps:$4 sm:$0xff]   ;;  %v2192_v9 = vld [vmem:[#allocation2 + $0x20] ss:$8 sps:$4 sm:$0xff]   ;;  %v399_v3 = vlaneseq }
  0x5e   :  { %153 = vadd.xlane.f32.xlu0 %v151_v2  ;;  %272 = vmatpush1.bf16.msra.mxu0 %v2186_v4  ;;  %v2193_v10 = vld [vmem:[#allocation2 + $0x34] ss:$8 sps:$4 sm:$0xff]   ;;  %v2195_v11 = vld [vmem:[#allocation2 + $0x30] ss:$8 sps:$4 sm:$0xff]   ;;  %v2196_v12 = vld [vmem:[#allocation2 + $0x44] ss:$8 sps:$4 sm:$0xff]  }
  0x5f   :  { %273 = vmatprep.subr.bf16.mxu0 %v2187_v5  ;;  %v2198_v13 = vld [vmem:[#allocation2 + $0x40] ss:$8 sps:$4 sm:$0xff]   ;;  %v2199_v14 = vld [vmem:[#allocation2 + $0x54] ss:$8 sps:$4 sm:$0xff]   ;;  %v2201_v15 = vld [vmem:[#allocation2 + $0x50] ss:$8 sps:$4 sm:$0xff]  }
  0x60   :  { %v2202_v16 = vld [vmem:[#allocation2 + $0x64] ss:$8 sps:$4 sm:$0xff]   ;;  %v2204_v18 = vld [vmem:[#allocation2 + $0x60] ss:$8 sps:$4 sm:$0xff]   ;;  %v2205_v19 = vld [vmem:[#allocation2 + $0x74] ss:$8 sps:$4 sm:$0xff]  }
  0x61   :  { %v2207_v20 = vld [vmem:[#allocation2 + $0x70] ss:$8 sps:$4 sm:$0xff]   ;;  %v1935_v30 = vld [vmem:[%s2862_s1] ss:$0 sm:$0xff]  ;;  %v2656_v39 = vld [vmem:[%s2868_s7 + $0x8] sm:$0xff]  ;;  %s2491_s17 = smov 63  }
  0x62   :  { %155 = vadd.xlane.f32.xlu0 %v152_v6  ;;  %274 = vmatpush1.bf16.msra.mxu0 %v2189_v7  ;;  %v316_v35 = vld [vmem:[%s2869_s8] sm:$0xff]  ;;  %vm338_vm0 = vcmask 1048064   ;;  %s2493_s23 = smov 65   ;;  %vm435_vm1 = vcmask 261120   ;;  %s2494_s24 = smov 96   ;;  %vm393_vm2 = vcmask 523264  }
  0x63   :  { %275 = vmatprep.subr.bf16.mxu0 %v2190_v8  ;;  %v314_v36 = vld [vmem:[%s2868_s7] sm:$0xff]  ;;  %s2492_s7 = smov 127   ;;  %v2495_v2 = vmov 0.0   ;;  %v400_v4 = vshrl.u32 %v399_v3, 7  ;;  %v427_v7 = vand.u32 127, %v399_v3  ;;  %vm522_vm5 = vcmask 64512  }
  0x64   :  { %v318_v43 = vld [vmem:[#allocation10] sm:$0xff]  ;;  %s2496_s5 = smov 32   ;;  %vm2497_vm6 = vmmov 0   ;;  %vm841_vm7 = vcmask 785408  }
  0x65   :  { %v401_v5 = vadd.s32 8, %v400_v4  ;;  %v406_v8 = vand.u32 7, %v400_v4 }
  0x66   :  { %276 = vmatpush1.bf16.msra.mxu0 %v2192_v9 }
  0x67   :  { %277 = vmatprep.subr.bf16.mxu0 %v2193_v10  ;;  %v413_v6 = vand.u32 7, %v401_v5  ;;  %vm428_vm4 = vcmp.gt.s32.totalorder %v427_v7, %v406_v8 }
  0x69   :  { %vm429_vm3 = vcmp.gt.s32.totalorder %v427_v7, %v413_v6 }
  0x6a   :  { %278 = vmatpush1.bf16.msra.mxu0 %v2195_v11  ;;  %v2691_v10 = vsel %vm429_vm3, -1e+09, %v2495_v2 }
  0x6b   :  { %279 = vmatprep.subr.bf16.mxu0 %v2196_v12 }
  0x6e   :  { %280 = vmatpush1.bf16.msra.mxu0 %v2198_v13  ;;  %v2694_v13 = vsel %vm428_vm4, -1e+09, %v2495_v2 }
  0x6f   :  { %281 = vmatprep.subr.bf16.mxu0 %v2199_v14 }
  0x72   :  { %282 = vmatpush1.bf16.msra.mxu0 %v2201_v15 }
  0x73   :  { %283 = vmatprep.subr.bf16.mxu0 %v2202_v16 }
  0x76   :  { %284 = vmatpush1.bf16.msra.mxu0 %v2204_v18 }
  0x77   :  { %285 = vmatprep.subr.bf16.mxu0 %v2205_v19 }
  0x78   :  { %355 = vrot.lane.b32.xlu0 %v316_v35, %s2490_s16 }
  0x7a   :  { %286 = vmatpush1.bf16.msra.mxu0 %v2207_v20  ;;  %v317_v20 = vld [vmem:[%s2869_s8 + $0x8] sm:$0xff] }
  0x7b   :  { %2128 = vmatprep.subr.bf16.mxu0 %v2495_v2 }
  0xeb   :  { %v154_v21 = vpop.xlane.xlu0 %153 }
  0xec   :  { %v158_v22 = vmul.f32 0.0078125, %v154_v21 }
  0xee   :  { %v160_v23 = vadd.f32 1e-05, %v158_v22 }
  0xef   :  { %v156_v24 = vpop.xlane.xlu0 %155 }
  0xf0   :  { %2280 = vrsqrt.f32 %v160_v23  ;;  %v159_v25 = vmul.f32 0.0078125, %v156_v24 }
  0xf2   :  { %v161_v26 = vadd.f32 1e-05, %v159_v25 }
  0xf3   :  { %v356_v48 = vpop.permute.xlu0 %355 }
  0xf4   :  { %2282 = vrsqrt.f32 %v161_v26 }
  0xfa   :  { %v2281_v27 = vpop.eup %2280 }
  0xfb   :  { %v164_v28 = vmul.f32 %v2281_v27, %v148_v0 }
  0xfd   :  { %v172_v32 = vmul.f32 %v1935_v30, %v164_v28 }
  0xfe   :  { %v2283_v29 = vpop.eup %2282 }
  0xff   :  { %v165_v31 = vmul.f32 %v2283_v29, %v149_v1 }
 0x101   :  { %v173_v33 = vmul.f32 %v1935_v30, %v165_v31 }
 0x103   :  { %v174_v34 = vpack.c.bf16 %v173_v33, %v172_v32 }
 0x105   :  { %304 = vmatmul.mubr.bf16.vlgmr.msra.gmra.mrb[0].mxu0 %v174_v34 }
 0x106   :  { %2144 = vmatprep.mubr.msk.bf16.mxu0 %vm2497_vm6, %v2495_v2 }
 0x1d8   :  { %v305_v37 = vpop.f32.mrb[0].mxu0 }
 0x1d9   :  { %v2651_v38 = vpop.f32.mrb[1].mxu0  ;;  %v328_v55 = vmul.f32 %v314_v36, %v305_v37 }
 0x1da   :  { %339 = vrot.lane.b32.xlu1 %v2651_v38, %s2479_s30  ;;  %v2660_v40 = vpop.f32.mrb[2].mxu0  ;;  %v351_v41 = vmul.f32 %v314_v36, %v2651_v38 }
 0x1db   :  { %v2663_v42 = vpop.f32.mrb[3].mxu0 }
 0x1dc   :  { %v2667_v44 = vmul.f32 %v2656_v39, %v2663_v42 }
 0x1de   :  { %375 = vrot.lane.b32.xlu1 %v318_v43, %s2491_s17 }
 0x24c   :  { %v340_v45 = vpop.permute.xlu1 %339 }
 0x24d   :  { %v341_v46 = vsel %vm338_vm0, %v340_v45, %v2651_v38 }
 0x24e   :  { %345 = vrot.lane.b32.xlu1 %v341_v46, %s2479_s30 }
 0x250   :  { %v376_v47 = vpop.permute.xlu1 %375 }
 0x252   :  { %320 = vrot.lane.b32.xlu1 %v305_v37, %s2492_s7 }
 0x256   :  { %324 = vrot.lane.b32.xlu1 %v305_v37, %s2490_s16 }
 0x2c0   :  { %v346_v49 = vpop.permute.xlu1 %345 }
 0x2c1   :  { %v349_v50 = vsel %vm338_vm0, %v346_v49, %v2651_v38 }
 0x2c2   :  { %v361_v51 = vmul.f32 %v356_v48, %v349_v50  ;;  %v381_v54 = vmul.f32 %v376_v47, %v349_v50 }
 0x2c4   :  { %v321_v52 = vpop.permute.xlu1 %320  ;;  %365 = vrot.lane.b32.xlu1 %v361_v51, %s2492_s7 }
 0x2c5   :  { %v330_v53 = vmul.f32 %v321_v52, %v316_v35  ;;  %v319_v35 = vld [vmem:[#allocation10 + $0x8] sm:$0xff] }
 0x2c7   :  { %v332_v57 = vadd.f32 %v330_v53, %v328_v55 }
 0x2c8   :  { %v325_v56 = vpop.permute.xlu1 %324  ;;  %385 = vrot.lane.b32.xlu1 %v381_v54, %s2493_s23 }
 0x2c9   :  { %v334_v58 = vmul.f32 %v325_v56, %v318_v43 }
 0x2cb   :  { %v336_v59 = vadd.f32 %v334_v58, %v332_v57 }
 0x2cd   :  { %2090 = vmatprep.mubr.msk.f32.mxu1 %vm435_vm1, %v336_v59  ;;  %433 = vrot.lane.b32.xlu1 %v336_v59, %s2494_s24 }
 0x336   :  { %v366_v60 = vpop.permute.xlu1 %365 }
 0x337   :  { %v371_v61 = vadd.f32 %v366_v60, %v351_v41 }
 0x33a   :  { %v386_v62 = vpop.permute.xlu1 %385 }
 0x33b   :  { %v391_v63 = vadd.f32 %v386_v62, %v371_v61 }
 0x33d   :  { %v394_v0 = vsel %vm393_vm2, %v391_v63, %v2651_v38  ;;  %2088 = vmatprep.subr.msk.mxu1 %vm435_vm1, %v391_v63 }
 0x33e   :  { %1912 = vst [vmem:[%s2873_s12] sm:$0xff] %v394_v0  ;;  %2089 = vmatpush3.xpose.msk.msra.mxu1 %vm435_vm1, %v391_v63 }
 0x33f   :  { %v434_v1 = vpop.permute.xlu1 %433 }
 0x341   :  { %2091 = vmatmul.mubr.msk.f32.vlgmr.msra.gmra.mrb[0].mxu1 %vm435_vm1, %v434_v1 }
 0x414   :  { %v2092_v9 = vpop.f32.mrb[0].mxu1 }
 0x415   :  { %v519_v11 = vmul.f32 0.17677669, %v2092_v9  ;;  %v509_v12 = vpop.f32.mrb[1].mxu1 }
 0x416   :  { %v518_v14 = vmul.f32 0.17677669, %v509_v12 }
 0x417   :  { %v521_v15 = vadd.f32 %v519_v11, %v2691_v10 }
 0x418   :  { %v520_v16 = vadd.f32 %v518_v14, %v2694_v13 }
 0x419   :  { %v526_v18 = vsel %vm522_vm5, %v521_v15, -inf }
 0x41a   :  { %527 = vmax.xlane.f32.xlu1 %v526_v18  ;;  %v523_v19 = vsel %vm522_vm5, %v520_v16, -inf }
 0x41b   :  { %524 = vmax.xlane.f32.xlu0 %v523_v19 }
 0x42b   :  { %634 = vrot.lane.b32.xlu1 %v391_v63, %s2494_s24 }
 0x42f   :  { %632 = vrot.lane.b32.xlu1 %v434_v1, %s2479_s30 }
 0x431   :  { %542 = vrot.lane.b32.xlu0 %v2651_v38, %s2479_s30 }
 0x435   :  { %630 = vrot.lane.b32.xlu0 %v336_v59, %s2479_s30 }
 0x439   :  { %342 = vrot.lane.b32.xlu0 %v2663_v42, %s2479_s30 }
 0x43d   :  { %357 = vrot.lane.b32.xlu0 %v317_v20, %s2490_s16 }
 0x441   :  { %322 = vrot.lane.b32.xlu0 %v2660_v40, %s2492_s7 }
 0x445   :  { %739 = vrot.lane.b32.xlu0 %v2651_v38, %s2496_s5  ;;  %v329_v38 = vmul.f32 %v2656_v39, %v2660_v40 }
 0x4a7   :  { %v528_v21 = vpop.xlane.xlu1 %527 }
 0x4a8   :  { %v530_v22 = vsub.f32 %v521_v15, %v528_v21  ;;  %v525_v23 = vpop.xlane.xlu0 %524 }
 0x4a9   :  { %v529_v24 = vsub.f32 %v520_v16, %v525_v23 }
 0x4aa   :  { %v533_v25 = vmul.f32 1.442695, %v530_v22 }
 0x4ab   :  { %v531_v26 = vmul.f32 1.442695, %v529_v24  ;;  %v635_v28 = vpop.permute.xlu1 %634 }
 0x4ac   :  { %v543_v27 = vpop.permute.xlu0 %542 }
 0x4ad   :  { %2284 = vpow2.f32 %v531_v26  ;;  %2093 = vmatprep.subr.mxu1 %v543_v27 }
 0x4ae   :  { %2286 = vpow2.f32 %v533_v25  ;;  %2094 = vmatpush3.msra.mxu1 %v543_v27 }
 0x4af   :  { %2098 = vmatprep.subr.msk.mxu1 %vm435_vm1, %v635_v28  ;;  %v633_v36 = vpop.permute.xlu1 %632 }
 0x4b0   :  { %v631_v29 = vpop.permute.xlu0 %630 }
 0x4b4   :  { %v343_v30 = vpop.permute.xlu0 %342 }
 0x4b5   :  { %v344_v31 = vsel %vm338_vm0, %v343_v30, %v2663_v42 }
 0x4b6   :  { %347 = vrot.lane.b32.xlu1 %v344_v31, %s2479_s30 }
 0x4b7   :  { %v2719_v32 = vpop.eup %2284 }
 0x4b8   :  { %v2721_v33 = vpop.eup %2286  ;;  %2095 = vmatprep.mubr.msk.f32.mxu1 %vm522_vm5, %v2719_v32  ;;  %v358_v34 = vpop.permute.xlu0 %357 }
 0x4b9   :  { %2096 = vmatmul.mubr.msk.f32.vlgmr.msra.gmra.mrb[2].mxu1 %vm522_vm5, %v2721_v33 }
 0x4ba   :  { %2099 = vmatpush3.xpose.msk.msra.mxu1 %vm435_vm1, %v635_v28  ;;  %2100 = vmatprep.mubr.msk.f32.mxu1 %vm435_vm1, %v631_v29 }
 0x4bb   :  { %377 = vrot.lane.b32.xlu1 %v319_v35, %s2491_s17 }
 0x4bc   :  { %v323_v37 = vpop.permute.xlu0 %322 }
 0x4bd   :  { %v331_v41 = vmul.f32 %v323_v37, %v317_v20  ;;  %2101 = vmatmul.mubr.msk.f32.vlgmr.msra.gmra.mrb[4].mxu1 %vm435_vm1, %v633_v36 }
 0x4bf   :  { %v333_v43 = vadd.f32 %v331_v41, %v329_v38  ;;  %326 = vrot.lane.b32.xlu1 %v2660_v40, %s2490_s16 }
 0x4c0   :  { %v740_v45 = vpop.permute.xlu0 %739 }
 0x4c1   :  { %2103 = vmatprep.subr.mxu1 %v740_v45 }
 0x4c2   :  { %2104 = vmatpush3.msra.mxu1 %v740_v45 }
 0x528   :  { %v348_v46 = vpop.permute.xlu1 %347 }
 0x529   :  { %v350_v47 = vsel %vm338_vm0, %v348_v46, %v2663_v42 }
 0x52a   :  { %v362_v48 = vmul.f32 %v358_v34, %v350_v47 }
 0x52c   :  { %367 = vrot.lane.b32.xlu1 %v362_v48, %s2492_s7 }
 0x52d   :  { %v378_v57 = vpop.permute.xlu1 %377 }
 0x52e   :  { %v382_v61 = vmul.f32 %v378_v57, %v350_v47 }
 0x531   :  { %v327_v58 = vpop.permute.xlu1 %326 }
 0x532   :  { %v335_v59 = vmul.f32 %v327_v58, %v319_v35 }
 0x534   :  { %v337_v60 = vadd.f32 %v335_v59, %v333_v43 }
 0x58c   :  { %v2738_v49 = vpop.f32.mrb[2].mxu1 }
 0x58d   :  { %v2740_v39 = vpop.f32.mrb[3].mxu1 }
 0x590   :  { %v2102_v50 = vpop.f32.mrb[4].mxu1 }
 0x591   :  { %v718_v51 = vmul.f32 0.17677669, %v2102_v50  ;;  %v708_v52 = vpop.f32.mrb[5].mxu1 }
 0x592   :  { %v717_v53 = vmul.f32 0.17677669, %v708_v52 }
 0x593   :  { %v720_v40 = vadd.f32 %v718_v51, %v2691_v10 }
 0x594   :  { %v719_v54 = vadd.f32 %v717_v53, %v2694_v13 }
 0x595   :  { %v724_v55 = vsel %vm522_vm5, %v720_v40, -inf }
 0x596   :  { %725 = vmax.xlane.f32.xlu1 %v724_v55  ;;  %v721_v56 = vsel %vm522_vm5, %v719_v54, -inf }
 0x597   :  { %722 = vmax.xlane.f32.xlu0 %v721_v56 }
 0x59e   :  { %v368_v62 = vpop.permute.xlu1 %367 }
 0x59f   :  { %v372_v5 = vadd.f32 %v368_v62, %v2667_v44 }
 0x5a7   :  { %844 = vrot.lane.b32.xlu1 %v337_v60, %s2494_s24 }
 0x5ad   :  { %387 = vrot.lane.b32.xlu0 %v382_v61, %s2493_s23 }
 0x623   :  { %v726_v63 = vpop.xlane.xlu1 %725 }
 0x624   :  { %v728_v0 = vsub.f32 %v720_v40, %v726_v63  ;;  %v723_v1 = vpop.xlane.xlu0 %722  ;;  %v538_v40 = vsel %vm522_vm5, %v2721_v33, 0.0 }
 0x625   :  { %v727_v3 = vsub.f32 %v719_v54, %v723_v1 }
 0x626   :  { %v731_v4 = vmul.f32 1.442695, %v728_v0 }
 0x627   :  { %v729_v6 = vmul.f32 1.442695, %v727_v3  ;;  %v845_v44 = vpop.permute.xlu1 %844 }
 0x628   :  { %v388_v7 = vpop.permute.xlu0 %387 }
 0x629   :  { %2288 = vpow2.f32 %v729_v6  ;;  %v392_v8 = vadd.f32 %v388_v7, %v372_v5 }
 0x62a   :  { %2290 = vpow2.f32 %v731_v4 }
 0x62b   :  { %v395_v9 = vsel %vm393_vm2, %v392_v8, %v2663_v42  ;;  %2108 = vmatprep.subr.msk.mxu1 %vm435_vm1, %v392_v8 }
 0x62c   :  { %1914 = vst [vmem:[%s2873_s12 + $0x10] sm:$0xff] %v395_v9 }
 0x633   :  { %v2289_v11 = vpop.eup %2288 }
 0x634   :  { %v2755_v12 = vpop.eup %2290  ;;  %2105 = vmatprep.mubr.msk.f32.mxu1 %vm522_vm5, %v2289_v11  ;;  %v733_v55 = vsel %vm522_vm5, %v2289_v11, 0.0  ;;  %v2208_v11 = vld [vmem:[#allocation5] sm:$0xff]  }
 0x635   :  { %2106 = vmatmul.mubr.msk.f32.vlgmr.msra.gmra.mrb[6].mxu1 %vm522_vm5, %v2755_v12  ;;  %2129 = vmatpush3.bf16.msra.mxu0 %v2208_v11 }
 0x636   :  { %2109 = vmatpush3.xpose.msk.msra.mxu1 %vm435_vm1, %v392_v8  ;;  %2110 = vmatprep.mubr.msk.f32.mxu1 %vm435_vm1, %v337_v60 }
 0x637   :  { %2130 = vmatprep.subr.bf16.mxu0 %v2495_v2 }
 0x639   :  { %2111 = vmatmul.mubr.msk.f32.vlgmr.msra.gmra.mrb[8].mxu1 %vm435_vm1, %v845_v44 }
 0x708   :  { %v2763_v14 = vpop.f32.mrb[6].mxu1 }
 0x709   :  { %v2765_v15 = vpop.f32.mrb[7].mxu1 }
 0x70c   :  { %v2112_v16 = vpop.f32.mrb[8].mxu1 }
 0x70d   :  { %v929_v18 = vmul.f32 0.17677669, %v2112_v16  ;;  %v919_v19 = vpop.f32.mrb[9].mxu1  ;;  %v2213_v16 = vld [vmem:[#allocation5 + $0x28] sm:$0xff]  }
 0x70e   :  { %v928_v20 = vmul.f32 0.17677669, %v919_v19 }
 0x70f   :  { %v931_v21 = vadd.f32 %v929_v18, %v2691_v10 }
 0x710   :  { %v930_v22 = vadd.f32 %v928_v20, %v2694_v13 }
 0x711   :  { %v935_v23 = vsel %vm522_vm5, %v931_v21, -inf }
 0x712   :  { %936 = vmax.xlane.f32.xlu1 %v935_v23  ;;  %v932_v24 = vsel %vm522_vm5, %v930_v22, -inf  ;;  %v2215_v23 = vld [vmem:[#allocation5 + $0x38] sm:$0xff]  }
 0x713   :  { %933 = vmax.xlane.f32.xlu0 %v932_v24 }
 0x723   :  { %1043 = vrot.lane.b32.xlu1 %v392_v8, %s2494_s24  ;;  %v535_v8 = vsel %vm522_vm5, %v2719_v32, 0.0  ;;  %v2212_v32 = vld [vmem:[#allocation5 + $0x20] sm:$0xff]  }
 0x727   :  { %1041 = vrot.lane.b32.xlu1 %v845_v44, %s2479_s30  ;;  %v2211_v44 = vld [vmem:[#allocation5 + $0x18] sm:$0xff]  }
 0x729   :  { %951 = vrot.lane.b32.xlu0 %v2663_v42, %s2479_s30 }
 0x72d   :  { %1039 = vrot.lane.b32.xlu0 %v337_v60, %s2479_s30 }
 0x79f   :  { %v937_v25 = vpop.xlane.xlu1 %936 }
 0x7a0   :  { %v939_v26 = vsub.f32 %v931_v21, %v937_v25  ;;  %v934_v27 = vpop.xlane.xlu0 %933 }
 0x7a1   :  { %v938_v28 = vsub.f32 %v930_v22, %v934_v27  ;;  %v2214_v22 = vld [vmem:[#allocation5 + $0x30] sm:$0xff]  }
 0x7a2   :  { %v942_v29 = vmul.f32 1.442695, %v939_v26 }
 0x7a3   :  { %v940_v30 = vmul.f32 1.442695, %v938_v28  ;;  %v1044_v34 = vpop.permute.xlu1 %1043 }
 0x7a4   :  { %v952_v31 = vpop.permute.xlu0 %951 }
 0x7a5   :  { %2292 = vpow2.f32 %v940_v30  ;;  %2113 = vmatprep.subr.mxu1 %v952_v31 }
 0x7a6   :  { %2294 = vpow2.f32 %v942_v29  ;;  %2114 = vmatpush3.msra.mxu1 %v952_v31 }
 0x7a7   :  { %2118 = vmatprep.subr.msk.mxu1 %vm435_vm1, %v1044_v34  ;;  %v1042_v38 = vpop.permute.xlu1 %1041 }
 0x7a8   :  { %v1040_v37 = vpop.permute.xlu0 %1039 }
 0x7af   :  { %v2293_v35 = vpop.eup %2292 }
 0x7b0   :  { %v2295_v36 = vpop.eup %2294  ;;  %2115 = vmatprep.mubr.msk.f32.mxu1 %vm522_vm5, %v2293_v35  ;;  %v944_v9 = vsel %vm522_vm5, %v2293_v35, 0.0 }
 0x7b1   :  { %2116 = vmatmul.mubr.msk.f32.vlgmr.msra.gmra.mrb[10].mxu1 %vm522_vm5, %v2295_v36  ;;  %v947_v54 = vsel %vm522_vm5, %v2295_v36, 0.0 }
 0x7b2   :  { %2119 = vmatpush3.xpose.msk.msra.mxu1 %vm435_vm1, %v1044_v34  ;;  %2120 = vmatprep.mubr.msk.f32.mxu1 %vm435_vm1, %v1040_v37 }
 0x7b5   :  { %2121 = vmatmul.mubr.msk.f32.vlgmr.msra.gmra.mrb[12].mxu1 %vm435_vm1, %v1042_v38 }
 0x884   :  { %v2117_v41 = vpop.f32.mrb[10].mxu1 }
 0x885   :  { %v2782_v43 = vpop.f32.mrb[11].mxu1 }
 0x888   :  { %v2122_v45 = vpop.f32.mrb[12].mxu1 }
 0x889   :  { %v1127_v46 = vmul.f32 0.17677669, %v2122_v45  ;;  %v1117_v47 = vpop.f32.mrb[13].mxu1 }
 0x88a   :  { %v1126_v48 = vmul.f32 0.17677669, %v1117_v47 }
 0x88b   :  { %v1129_v50 = vadd.f32 %v1127_v46, %v2691_v10  ;;  %v736_v10 = vsel %vm522_vm5, %v2755_v12, 0.0  ;;  %v2209_v12 = vld [vmem:[#allocation5 + $0x8] sm:$0xff]  }
 0x88c   :  { %v1128_v51 = vadd.f32 %v1126_v48, %v2694_v13  ;;  %2131 = vmatpush3.bf16.msra.mxu0 %v2209_v12 }
 0x88d   :  { %v1133_v52 = vsel %vm522_vm5, %v1129_v50, -inf  ;;  %2132 = vmatprep.subr.bf16.mxu0 %v2495_v2 }
 0x88e   :  { %1134 = vmax.xlane.f32.xlu1 %v1133_v52  ;;  %v1130_v53 = vsel %vm522_vm5, %v1128_v51, -inf }
 0x88f   :  { %1131 = vmax.xlane.f32.xlu0 %v1130_v53 }
 0x892   :  { %539 = vadd.xlane.f32.xlu1 %v538_v40 }
 0x896   :  { %948 = vadd.xlane.f32.xlu1 %v947_v54 }
 0x89a   :  { %734 = vadd.xlane.f32.xlu1 %v733_v55 }
 0x8a5   :  { %1148 = vrot.lane.b32.xlu0 %v2663_v42, %s2496_s5 }
 0x8c4   :  { %737 = vadd.xlane.f32.xlu0 %v736_v10 }
 0x91b   :  { %v1135_v13 = vpop.xlane.xlu1 %1134 }
 0x91c   :  { %v1137_v56 = vsub.f32 %v1129_v50, %v1135_v13  ;;  %v1132_v57 = vpop.xlane.xlu0 %1131 }
 0x91d   :  { %v1136_v58 = vsub.f32 %v1128_v51, %v1132_v57 }
 0x91e   :  { %v1140_v59 = vmul.f32 1.442695, %v1137_v56 }
 0x91f   :  { %v1138_v33 = vmul.f32 1.442695, %v1136_v58  ;;  %v540_v60 = vpop.xlane.xlu1 %539  ;;  %v2216_v58 = vld [vmem:[#allocation7] ss:$16 sps:$4 sm:$0xff]  }
 0x920   :  { %2296 = vpow2.f32 %v1140_v59  ;;  %v1149_v61 = vpop.permute.xlu0 %1148  ;;  %v2218_v59 = vld [vmem:[#allocation7 + $0x4] ss:$16 sps:$4 sm:$0xff]  }
 0x921   :  { %2298 = vpow2.f32 %v1138_v33  ;;  %2123 = vmatprep.subr.mxu1 %v1149_v61  ;;  %v2219_v33 = vld [vmem:[#allocation7 + $0x8] ss:$16 sps:$4 sm:$0xff]  }
 0x922   :  { %2300 = vrcp.f32 %v540_v60  ;;  %2124 = vmatpush3.msra.mxu1 %v1149_v61  ;;  %v2221_v60 = vld [vmem:[#allocation7 + $0xc] ss:$16 sps:$4 sm:$0xff]   ;;  %v2224_v61 = vld [vmem:[#allocation7 + $0x24] ss:$16 sps:$4 sm:$0xff]  }
 0x923   :  { %v949_v62 = vpop.xlane.xlu1 %948  ;;  %1575 = vmatprep.subr.bf16.mxu1 %v2218_v59  ;;  %v2273_v59 = vld [vmem:[#allocation8 + $0x20] sm:$0xff]  }
 0x924   :  { %2302 = vrcp.f32 %v949_v62  ;;  %v2227_v62 = vld [vmem:[#allocation7 + $0x2c] ss:$16 sps:$4 sm:$0xff]  }
 0x927   :  { %v735_v18 = vpop.xlane.xlu1 %734 }
 0x92a   :  { %v2297_v42 = vpop.eup %2296 }
 0x92b   :  { %v2299_v63 = vpop.eup %2298  ;;  %v1145_v6 = vsel %vm522_vm5, %v2297_v42, 0.0 }
 0x92c   :  { %v2301_v0 = vpop.eup %2300  ;;  %2125 = vmatprep.mubr.msk.f32.mxu1 %vm522_vm5, %v2299_v63  ;;  %v1142_v1 = vsel %vm522_vm5, %v2299_v63, 0.0  ;;  %v2225_v63 = vld [vmem:[#allocation7 + $0x28] ss:$16 sps:$4 sm:$0xff]  }
 0x92d   :  { %1143 = vadd.xlane.f32.xlu1 %v1142_v1  ;;  %2126 = vmatmul.mubr.msk.f32.vlgmr.msra.gmra.mrb[14].mxu1 %vm522_vm5, %v2297_v42  ;;  %v629_v4 = vmul.f32 %v2301_v0, %v2738_v49  ;;  %v2210_v49 = vld [vmem:[#allocation5 + $0x10] sm:$0xff]   ;;  %v2233_v1 = vld [vmem:[#allocation7 + $0x4c] ss:$16 sps:$4 sm:$0xff]  }
 0x92e   :  { %v2303_v3 = vpop.eup %2302  ;;  %1607 = vmatprep.mubr.bf16.mxu1 %v2489_v17  ;;  %2133 = vmatpush3.bf16.msra.mxu0 %v2210_v49  ;;  %v2222_v42 = vld [vmem:[#allocation7 + $0x20] ss:$16 sps:$4 sm:$0xff]   ;;  %v2230_v0 = vld [vmem:[#allocation7 + $0x44] ss:$16 sps:$4 sm:$0xff]  }
 0x92f   :  { %v1038_v5 = vmul.f32 %v2303_v3, %v2117_v41  ;;  %2134 = vmatprep.subr.bf16.mxu0 %v2495_v2  ;;  %1576 = vmatpush1.bf16.msra.mxu1 %v2216_v58  ;;  %v2228_v3 = vld [vmem:[#allocation7 + $0x40] ss:$16 sps:$4 sm:$0xff]  }
 0x930   :  { %1577 = vmatprep.subr.bf16.mxu1 %v2224_v61  ;;  %v2272_v58 = vld [vmem:[#allocation8 + $0x60] sm:$0xff]   ;;  %v2276_v61 = vld [vmem:[#allocation8 + $0x70] sm:$0xff]  }
 0x931   :  { %1146 = vadd.xlane.f32.xlu1 %v1145_v6  ;;  %v2169_v7 = vpack.i.bf16 %v1038_v5, %v629_v4  ;;  %v2336_v5 = vld [vmem:[%s2861_s0] sm:$0xff] }
 0x932   :  { %2135 = vmatpush3.bf16.msra.mxu0 %v2211_v44 }
 0x933   :  { %2136 = vmatprep.subr.bf16.mxu0 %v2495_v2  ;;  %1578 = vmatpush1.bf16.msra.mxu1 %v2222_v42  ;;  %v2278_v42 = vld [vmem:[#allocation8 + $0x78] sm:$0xff]  }
 0x934   :  { %1579 = vmatprep.subr.bf16.mxu1 %v2230_v0 }
 0x935   :  { %536 = vadd.xlane.f32.xlu1 %v535_v8 }
 0x936   :  { %2137 = vmatpush3.bf16.msra.mxu0 %v2212_v32  ;;  %v2236_v32 = vld [vmem:[#allocation7 + $0x64] ss:$16 sps:$4 sm:$0xff]  }
 0x937   :  { %2138 = vmatprep.subr.bf16.mxu0 %v2495_v2  ;;  %1580 = vmatpush1.bf16.msra.mxu1 %v2228_v3 }
 0x938   :  { %1581 = vmatprep.subr.bf16.mxu1 %v2236_v32 }
 0x939   :  { %945 = vadd.xlane.f32.xlu1 %v944_v9  ;;  %v2337_v9 = vld [vmem:[%s2861_s0 + $0x8] sm:$0xff] }
 0x93a   :  { %2139 = vmatpush3.bf16.msra.mxu0 %v2213_v16  ;;  %v2239_v16 = vld [vmem:[#allocation7 + $0x6c] ss:$16 sps:$4 sm:$0xff]  }
 0x93b   :  { %2140 = vmatprep.subr.bf16.mxu0 %v2495_v2 }
 0x93e   :  { %2141 = vmatpush3.bf16.msra.mxu0 %v2214_v22  ;;  %v2243_v22 = vld [vmem:[#allocation7 + $0x88] ss:$16 sps:$4 sm:$0xff]  }
 0x93f   :  { %2142 = vmatprep.subr.bf16.mxu0 %v2495_v2 }
 0x942   :  { %2143 = vmatpush3.bf16.msra.mxu0 %v2215_v23  ;;  %v2245_v23 = vld [vmem:[#allocation7 + $0x8c] ss:$16 sps:$4 sm:$0xff]  }
 0x943   :  { %1618 = vmatprep.subr.bf16.mxu0 %v2221_v60  ;;  %v2275_v60 = vld [vmem:[#allocation8 + $0x28] sm:$0xff]  }
 0x94a   :  { %2170 = vrot.lane.b32.xlu1 %v2169_v7, %s2496_s5 }
 0x951   :  { %v738_v20 = vpop.xlane.xlu0 %737 }
 0x952   :  { %2304 = vrcp.f32 %v738_v20  ;;  %v2240_v20 = vld [vmem:[#allocation7 + $0x80] ss:$16 sps:$4 sm:$0xff]  }
 0x953   :  { %2306 = vrcp.f32 %v735_v18  ;;  %v2234_v18 = vld [vmem:[#allocation7 + $0x60] ss:$16 sps:$4 sm:$0xff]  }
 0x954   :  { %1582 = vmatpush1.bf16.msra.mxu1 %v2234_v18 }
 0x95c   :  { %v2305_v24 = vpop.eup %2304 }
 0x95d   :  { %v2307_v25 = vpop.eup %2306  ;;  %v826_v29 = vmul.f32 %v2305_v24, %v2763_v14  ;;  %v2248_v24 = vld [vmem:[#allocation7 + $0xa4] ss:$16 sps:$4 sm:$0xff]  }
 0x95e   :  { %v825_v35 = vmul.f32 %v2307_v25, %v2765_v15  ;;  %v2251_v25 = vld [vmem:[#allocation7 + $0xac] ss:$16 sps:$4 sm:$0xff]  }
 0x9ba   :  { %v1144_v19 = vpop.xlane.xlu1 %1143 }
 0x9be   :  { %v1147_v21 = vpop.xlane.xlu1 %1146 }
 0x9bf   :  { %2308 = vrcp.f32 %v1147_v21  ;;  %v2242_v21 = vld [vmem:[#allocation7 + $0x84] ss:$16 sps:$4 sm:$0xff]  }
 0x9c0   :  { %2310 = vrcp.f32 %v1144_v19  ;;  %v2237_v19 = vld [vmem:[#allocation7 + $0x68] ss:$16 sps:$4 sm:$0xff]   ;;  %1583 = vmatprep.subr.bf16.mxu1 %v2242_v21 }
 0x9c1   :  { %1584 = vmatpush1.bf16.msra.mxu1 %v2240_v20 }
 0x9c2   :  { %v537_v2 = vpop.xlane.xlu1 %536  ;;  %1585 = vmatprep.subr.bf16.mxu1 %v2248_v24 }
 0x9c3   :  { %2312 = vrcp.f32 %v537_v2 }
 0x9c6   :  { %v946_v38 = vpop.xlane.xlu1 %945 }
 0x9c7   :  { %2314 = vrcp.f32 %v946_v38 }
 0x9c9   :  { %v2309_v26 = vpop.eup %2308 }
 0x9ca   :  { %v2311_v28 = vpop.eup %2310  ;;  %v2171_v46 = vpop.permute.xlu1 %2170 }
 0x9cb   :  { %v2173_v50 = vunpack.i.h.bf16 %v2171_v46  ;;  %v2172_v15 = vunpack.i.l.bf16 %v2171_v46 }
 0x9cd   :  { %v2313_v41 = vpop.eup %2312 }
 0x9ce   :  { %v628_v14 = vmul.f32 %v2313_v41, %v2740_v39 }
 0x9d0   :  { %v839_v54 = vsel %vm435_vm1, %v628_v14, %v2172_v15  ;;  %v1980_v15 = vld [vmem:[%s2863_s2] ss:$0 sm:$0xff]  ;;  %s2498_s2 = smov [#allocation12]  }
 0x9d1   :  { %v2315_v45 = vpop.eup %2314  ;;  %s1873_s14 = sshll.u32 %s2498_s2, 4  ;;  %s1874_s14 = int_to_ptr.vmem [resolvable:$true] %s1873_s14 }
 0x9d2   :  { %v1037_v47 = vmul.f32 %v2315_v45, %v2782_v43  ;;  %s2448_s9 = scalar_lea.vmem %s1874_s14, 256  ;;  %p2453_p13 = scmp.lt.s32.totalorder %s1874_s14, %s1874_s14 }
 0x9d3   :  { %p2449_p12 = scmp.ne.s32.totalorder %s1874_s14, %s2448_s9  ;;  %p2454_p0 = scmp.lt.s32.totalorder %s2448_s9, %s2448_s9 }
 0x9d4   :  { %v1248_v40 = vsel %vm435_vm1, %v1037_v47, %v2173_v50 }
 0x9d5   :  { %p2455_p1 = por %p2454_p0, %p2453_p13 }
 0x9d7   :  { %p2456_p2 = pnand %p2455_p1, %p2449_p12 }
 0xa00   :  { %v2127_v27 = vpop.f32.mrb[14].mxu1 }
 0xa01   :  { %v1235_v30 = vmul.f32 %v2309_v26, %v2127_v27  ;;  %v1223_v31 = vpop.f32.mrb[15].mxu1  ;;  %v2246_v26 = vld [vmem:[#allocation7 + $0xa0] ss:$16 sps:$4 sm:$0xff]   ;;  %v2249_v27 = vld [vmem:[#allocation7 + $0xa8] ss:$16 sps:$4 sm:$0xff]  }
 0xa02   :  { %v1234_v34 = vmul.f32 %v2311_v28, %v1223_v31  ;;  %v2254_v28 = vld [vmem:[#allocation7 + $0xc4] ss:$16 sps:$4 sm:$0xff]   ;;  %1586 = vmatpush1.bf16.msra.mxu1 %v2246_v26  ;;  %v2255_v31 = vld [vmem:[#allocation7 + $0xc8] ss:$16 sps:$4 sm:$0xff]  }
 0xa03   :  { %v2179_v36 = vpack.i.bf16 %v1235_v30, %v826_v29  ;;  %v2257_v29 = vld [vmem:[#allocation7 + $0xcc] ss:$16 sps:$4 sm:$0xff]   ;;  %v2252_v30 = vld [vmem:[#allocation7 + $0xc0] ss:$16 sps:$4 sm:$0xff]   ;;  %1587 = vmatprep.subr.bf16.mxu1 %v2254_v28 }
 0xa04   :  { %v2174_v37 = vpack.i.bf16 %v1234_v34, %v825_v35  ;;  %v2260_v34 = vld [vmem:[#allocation7 + $0xe4] ss:$16 sps:$4 sm:$0xff]   ;;  %v2263_v35 = vld [vmem:[#allocation7 + $0xec] ss:$16 sps:$4 sm:$0xff]  }
 0xa05   :  { %2180 = vrot.lane.b32.xlu0 %v2179_v36, %s2494_s24  ;;  %v2258_v36 = vld [vmem:[#allocation7 + $0xe0] ss:$16 sps:$4 sm:$0xff]  }
 0xa06   :  { %2175 = vrot.lane.b32.xlu1 %v2174_v37, %s2479_s30  ;;  %1588 = vmatpush1.bf16.msra.mxu1 %v2252_v30  ;;  %v2261_v37 = vld [vmem:[#allocation7 + $0xe8] ss:$16 sps:$4 sm:$0xff]  }
 0xa07   :  { %1589 = vmatprep.subr.bf16.mxu1 %v2260_v34 }
 0xa0a   :  { %1590 = vmatpush1.bf16.msra.mxu1 %v2258_v36 }
 0xa77   :  { %v2181_v48 = vpop.permute.xlu0 %2180 }
 0xa78   :  { %v2176_v51 = vpop.permute.xlu1 %2175  ;;  %v2183_v55 = vunpack.i.h.bf16 %v2181_v48  ;;  %v2182_v10 = vunpack.i.l.bf16 %v2181_v48 }
 0xa79   :  { %v2178_v52 = vunpack.i.h.bf16 %v2176_v51  ;;  %v2177_v53 = vunpack.i.l.bf16 %v2176_v51 }
 0xa7b   :  { %v1249_v13 = vsel %vm393_vm2, %v1248_v40, %v2178_v52  ;;  %v840_v56 = vsel %vm393_vm2, %v839_v54, %v2177_v53  ;;  %v2264_v54 = vld [vmem:[#allocation8 + $0x40] sm:$0xff]  }
 0xa7c   :  { %v842_v39 = vsel %vm841_vm7, %v840_v56, %v2182_v10  ;;  %v1250_v57 = vsel %vm841_vm7, %v1249_v13, %v2183_v55  ;;  %v2265_v55 = vld [vmem:[#allocation8] sm:$0xff]   ;;  %2066 = vmatprep.subr.bf16.mxu1 %v2264_v54  ;;  %v2266_v10 = vld [vmem:[#allocation8 + $0x48] sm:$0xff]   ;;  %v2268_v56 = vld [vmem:[#allocation8 + $0x50] sm:$0xff]  }
 0xa7d   :  { %v1251_v43 = vpack.c.bf16 %v1250_v57, %v842_v39  ;;  %v2267_v13 = vld [vmem:[#allocation8 + $0x8] sm:$0xff]   ;;  %v2269_v39 = vld [vmem:[#allocation8 + $0x10] sm:$0xff]   ;;  %v2270_v57 = vld [vmem:[#allocation8 + $0x58] sm:$0xff]  }
 0xa7f   :  { %2145 = vmatmul.mubr.bf16.vlgmr.msra.gmra.mrb[4].mxu0 %v1251_v43  ;;  %v2271_v43 = vld [vmem:[#allocation8 + $0x18] sm:$0xff]  }
 0xa80   :  { %1650 = vmatprep.mubr.bf16.mxu0 %v2489_v17  ;;  %1619 = vmatpush1.bf16.msra.mxu0 %v2219_v33  ;;  %v2231_v17 = vld [vmem:[#allocation7 + $0x48] ss:$16 sps:$4 sm:$0xff]  }
 0xa81   :  { %1620 = vmatprep.subr.bf16.mxu0 %v2227_v62  ;;  %v2274_v33 = vld [vmem:[#allocation8 + $0x68] sm:$0xff]   ;;  %v2277_v62 = vld [vmem:[#allocation8 + $0x30] sm:$0xff]  }
 0xa84   :  { %1621 = vmatpush1.bf16.msra.mxu0 %v2225_v63  ;;  %v2279_v63 = vld [vmem:[#allocation8 + $0x38] sm:$0xff]  }
 0xa85   :  { %1622 = vmatprep.subr.bf16.mxu0 %v2233_v1 }
 0xa88   :  { %1623 = vmatpush1.bf16.msra.mxu0 %v2231_v17 }
 0xa89   :  { %1624 = vmatprep.subr.bf16.mxu0 %v2239_v16 }
 0xa8c   :  { %1625 = vmatpush1.bf16.msra.mxu0 %v2237_v19 }
 0xa8d   :  { %1626 = vmatprep.subr.bf16.mxu0 %v2245_v23 }
 0xa90   :  { %1627 = vmatpush1.bf16.msra.mxu0 %v2243_v22 }
 0xa91   :  { %1628 = vmatprep.subr.bf16.mxu0 %v2251_v25 }
 0xa94   :  { %1629 = vmatpush1.bf16.msra.mxu0 %v2249_v27 }
 0xa95   :  { %1630 = vmatprep.subr.bf16.mxu0 %v2257_v29 }
 0xa98   :  { %1631 = vmatpush1.bf16.msra.mxu0 %v2255_v31 }
 0xa99   :  { %1632 = vmatprep.subr.bf16.mxu0 %v2263_v35 }
 0xa9c   :  { %1633 = vmatpush1.bf16.msra.mxu0 %v2261_v37 }
 0xb52   :  { %v1350_v4 = vpop.f32.mrb[4].mxu0 }
 0xb53   :  { %v2828_v6 = vadd.f32 %v2336_v5, %v1350_v4  ;;  %v2146_v7 = vpop.f32.mrb[5].mxu0 }
 0xb54   :  { %v1353_v8 = vpop.f32.mrb[6].mxu0 }
 0xb55   :  { %v2833_v11 = vadd.f32 %v2337_v9, %v1353_v8  ;;  %v2147_v12 = vpop.f32.mrb[7].mxu0  ;;  %v1360_v49 = vmul.f32 %v2828_v6, %v2828_v6 }
 0xb57   :  { %1362 = vadd.xlane.f32.xlu1 %v1360_v49  ;;  %v1361_v44 = vmul.f32 %v2833_v11, %v2833_v11 }
 0xb59   :  { %1364 = vadd.xlane.f32.xlu0 %v1361_v44 }
 0xbe4   :  { %v1363_v2 = vpop.xlane.xlu1 %1362 }
 0xbe5   :  { %v1366_v38 = vmul.f32 0.0078125, %v1363_v2 }
 0xbe6   :  { %v1365_v41 = vpop.xlane.xlu0 %1364 }
 0xbe7   :  { %v1368_v45 = vadd.f32 1e-05, %v1366_v38  ;;  %v1367_v46 = vmul.f32 0.0078125, %v1365_v41 }
 0xbe9   :  { %2316 = vrsqrt.f32 %v1368_v45  ;;  %v1369_v14 = vadd.f32 1e-05, %v1367_v46 }
 0xbeb   :  { %2318 = vrsqrt.f32 %v1369_v14 }
 0xbf3   :  { %v2317_v47 = vpop.eup %2316 }
 0xbf4   :  { %v1372_v48 = vmul.f32 %v2317_v47, %v2828_v6 }
 0xbf5   :  { %v2319_v50 = vpop.eup %2318 }
 0xbf6   :  { %v1373_v51 = vmul.f32 %v2319_v50, %v2833_v11  ;;  %v1380_v52 = vmul.f32 %v1980_v15, %v1372_v48 }
 0xbf8   :  { %v1381_v53 = vmul.f32 %v1980_v15, %v1373_v51 }
 0xbfa   :  { %v1382_v40 = vpack.c.bf16 %v1381_v53, %v1380_v52 }
 0xbfc   :  { %1608 = vmatmul.mubr.bf16.vlgmr.msra.gmra.mrb[16].mxu1 %v1382_v40  ;;  %1651 = vmatmul.mubr.bf16.vlgmr.msra.gmra.mrb[8].mxu0 %v1382_v40 }
 0xbfd   :  { %2067 = vmatpush3.bf16.msra.mxu1 %v2265_v55 }
 0xbfe   :  { %2068 = vmatprep.subr.bf16.mxu1 %v2266_v10 }
 0xc01   :  { %2069 = vmatpush3.bf16.msra.mxu1 %v2267_v13 }
 0xc02   :  { %2070 = vmatprep.subr.bf16.mxu1 %v2268_v56 }
 0xc05   :  { %2071 = vmatpush3.bf16.msra.mxu1 %v2269_v39 }
 0xc06   :  { %2072 = vmatprep.subr.bf16.mxu1 %v2270_v57 }
 0xc09   :  { %2073 = vmatpush3.bf16.msra.mxu1 %v2271_v43 }
 0xc0a   :  { %2074 = vmatprep.subr.bf16.mxu1 %v2272_v58 }
 0xc0d   :  { %2075 = vmatpush3.bf16.msra.mxu1 %v2273_v59 }
 0xc0e   :  { %2076 = vmatprep.subr.bf16.mxu1 %v2274_v33 }
 0xc11   :  { %2077 = vmatpush3.bf16.msra.mxu1 %v2275_v60 }
 0xc12   :  { %2078 = vmatprep.subr.bf16.mxu1 %v2276_v61 }
 0xc15   :  { %2079 = vmatpush3.bf16.msra.mxu1 %v2277_v62 }
 0xc16   :  { %2080 = vmatprep.subr.bf16.mxu1 %v2278_v42 }
 0xc19   :  { %2081 = vmatpush3.bf16.msra.mxu1 %v2279_v63 }
 0xccf   :  { %v1609_v0 = vpop.f32.mrb[16].mxu1  ;;  %v1652_v1 = vpop.f32.mrb[8].mxu0 }
 0xcd0   :  { %v2013_v3 = vmul.f32 -1.442695, %v1609_v0  ;;  %v1611_v17 = vpop.f32.mrb[17].mxu1  ;;  %v1654_v4 = vpop.f32.mrb[9].mxu0 }
 0xcd1   :  { %v2014_v5 = vmul.f32 -1.442695, %v1611_v17  ;;  %v1613_v7 = vpop.f32.mrb[18].mxu1  ;;  %v1656_v8 = vpop.f32.mrb[10].mxu0 }
 0xcd2   :  { %2320 = vpow2.f32 %v2013_v3  ;;  %v2015_v9 = vmul.f32 -1.442695, %v1613_v7  ;;  %v1615_v12 = vpop.f32.mrb[19].mxu1  ;;  %v1658_v49 = vpop.f32.mrb[11].mxu0 }
 0xcd3   :  { %2322 = vpow2.f32 %v2014_v5  ;;  %v2016_v44 = vmul.f32 -1.442695, %v1615_v12 }
 0xcd4   :  { %2324 = vpow2.f32 %v2015_v9 }
 0xcd5   :  { %2326 = vpow2.f32 %v2016_v44 }
 0xcdc   :  { %v2321_v32 = vpop.eup %2320 }
 0xcdd   :  { %v2323_v16 = vpop.eup %2322  ;;  %v1673_v18 = vadd.f32 1.0, %v2321_v32 }
 0xcde   :  { %v2325_v19 = vpop.eup %2324  ;;  %v1674_v20 = vadd.f32 1.0, %v2323_v16 }
 0xcdf   :  { %v2327_v21 = vpop.eup %2326  ;;  %2328 = vrcp.f32 %v1673_v18  ;;  %v1675_v22 = vadd.f32 1.0, %v2325_v19 }
 0xce0   :  { %2330 = vrcp.f32 %v1674_v20  ;;  %v1676_v23 = vadd.f32 1.0, %v2327_v21 }
 0xce1   :  { %2332 = vrcp.f32 %v1675_v22 }
 0xce2   :  { %2334 = vrcp.f32 %v1676_v23 }
 0xce9   :  { %v2329_v24 = vpop.eup %2328 }
 0xcea   :  { %v2331_v25 = vpop.eup %2330  ;;  %v1685_v26 = vmul.f32 %v2329_v24, %v1609_v0 }
 0xceb   :  { %v2333_v27 = vpop.eup %2332  ;;  %v1686_v28 = vmul.f32 %v2331_v25, %v1611_v17 }
 0xcec   :  { %v2335_v29 = vpop.eup %2334  ;;  %v1689_v30 = vmul.f32 %v1685_v26, %v1652_v1  ;;  %v1687_v31 = vmul.f32 %v2333_v27, %v1613_v7 }
 0xced   :  { %v1690_v34 = vmul.f32 %v1686_v28, %v1654_v4  ;;  %v1688_v35 = vmul.f32 %v2335_v29, %v1615_v12 }
 0xcee   :  { %v1691_v36 = vmul.f32 %v1687_v31, %v1656_v8 }
 0xcef   :  { %v1692_v37 = vmul.f32 %v1688_v35, %v1658_v49 }
 0xcf0   :  { %v1693_v2 = vpack.c.bf16 %v1691_v36, %v1689_v30 }
 0xcf1   :  { %v1694_v38 = vpack.c.bf16 %v1692_v37, %v1690_v34 }
 0xcf3   :  { %1855 = vmatprep.mubr.bf16.mxu1 %v1694_v38 }
 0xcf4   :  { %1856 = vmatmul.mubr.bf16.vlgmr.msra.gmra.mrb[20].mxu1 %v1693_v2 }
 0xdc7   :  { %v2082_v41 = vpop.f32.mrb[20].mxu1 }
 0xdc8   :  { %v2083_v45 = vpop.f32.mrb[21].mxu1 }
 0xdc9   :  { %v2084_v46 = vadd.f32 %v2083_v45, %v2082_v41  ;;  %v2085_v14 = vpop.f32.mrb[22].mxu1 }
 0xdca   :  { %v2086_v47 = vpop.f32.mrb[23].mxu1 }
 0xdcb   :  { %v1864_v48 = vadd.f32 %v2084_v46, %v2828_v6  ;;  %v2087_v50 = vadd.f32 %v2086_v47, %v2085_v14 }
 0xdcd   :  { %1866 = vst [vmem:[#allocation12] sm:$0xff] %v1864_v48  ;;  %v1865_v15 = vadd.f32 %v2087_v50, %v2833_v11 }
 0xdcf   :  { %1867 = vst [vmem:[#allocation12 + $0x8] sm:$0xff] %v1865_v15 }
 0xdd0   :  { %2459 = shalt.err (!%p2456_p2)
}
 0xdd1   :  { %s2460_s15 = scalar_lea.hbm %s2872_s11, 256 }
 0xdd2   :  { %p2461_p3 = scmp.ne.s32.totalorder %s2872_s11, %s2460_s15  ;;  %p2464_p4 = scmp.lt.u32.totalorder %s2460_s15, %s2872_s11 }
 0xdd4   :  { %p2466_p5 = pnand %p2464_p4, %p2461_p3 }
 0xdd6   :  { %2469 = shalt.err (!%p2466_p5)
}
 0xdd7   :  { %1879 = dma.vmem_to_hbm [thread:$0]  %s1874_s14, 256, %s2872_s11, [#allocation4], %s2483_s6, %s2483_s6, %s2484_s13  }
 0xdd8   :  { %2476 = dma.done.wait [#allocation4], 256  }
 0xdd9   :  { %2477 = vsyncadd [#allocation4], 4294967040 }
 0xdda   :  { %1923 = vsyncpa [#allocation3], 1 }
 0xddb   :  { %1924 = vsyncpa [#allocation6], 1 }
 0xddc   :  { %1925 = vsyncpa [#allocation9], 1 }
 0xddd   :  { %1926 = vsyncpa [#allocation4], 1 }

</bundles_post_ra>
